<compile_context>
chip_gen: v5e
topology: v5e:2x2
jax: 0.10.0
libtpu: 0.0.40
codegen_flags: <defaults>
</compile_context>

<pallas_src>
import functools

import jax
import jax.numpy as jnp
import numpy as np
from jax.experimental import pallas as pl
from jax.experimental.pallas import tpu as pltpu


def _inverted_residual_kernel(x_ref, w1_ref, b1_ref, wd_ref, b2_ref,
                              w3_ref, b3_ref, o_ref, xpad_scr, *,
                              H, W, Hp, Wp, Ho, Wo, pb, stride, dilation,
                              use_res_connect):
    # Block shapes (one batch element per grid step), channels-first / flat spatial:
    #   x_ref:  (1, Cin, H*W)      o_ref: (1, Cout, Ho*Wo)
    #   w1_ref: (hidden, Cin)      wd_ref: (hidden, 9)     w3_ref: (Cout, hidden)
    #   b*_ref: (C, 1)             xpad_scr: (Cin, Hp*Wp) VMEM scratch
    f32 = jnp.float32
    hi = jax.lax.Precision.HIGHEST
    d = dilation

    # --- fixed_padding(x, 3, dilation) assembled in a flat (Cin, Hp*Wp) scratch ----
    # x is read from HBM exactly once; halo lanes are zero; the residual is taken
    # from the same tile.  The full zero-fill is only a few vregs at this Cin.
    # TODO(synk): at production H (~112) turn this unrolled scatter into a
    #             lax.fori_loop(unroll=4) over 128-aligned rows (review item).
    x2 = x_ref[0].astype(f32)                                   # (Cin, H*W)
    xpad_scr[...] = jnp.zeros(xpad_scr.shape, xpad_scr.dtype)
    for i in range(H):
        dst = (i + pb) * Wp + pb
        xpad_scr[:, dst:dst + W] = x2[:, i * W:(i + 1) * W]
    xp = xpad_scr[...]                                          # (Cin, Hp*Wp)

    w1 = w1_ref[...].astype(f32)                                # BN1 scale pre-folded
    b1 = b1_ref[...].astype(f32)
    wd = wd_ref[...].astype(f32)                                # BN2 scale pre-folded
    b2 = b2_ref[...].astype(f32)
    w3 = w3_ref[...].astype(f32)                                # BN3 scale pre-folded
    b3 = b3_ref[...].astype(f32)

    # ---- 1x1 expand conv (MXU) + BN bias + ReLU6 ---------------------------------
    # conv1x1(pad(x)) -> border columns become clip(b1, 0, 6), exactly as the
    # PyTorch graph (pad -> conv -> BN -> ReLU6) produces.
    h = jnp.dot(w1, xp, preferred_element_type=f32, precision=hi)
    h = jnp.clip(h + b1, 0.0, 6.0)                              # (hidden, Hp*Wp)

    if stride == 1:
        # ---- 3x3 depthwise conv, stride 1 (VPU taps, XLU-lean slicing) -----------
        Q = (Ho - 1) * Wp + Wo          # flat span covering all valid outputs
        L = 2 * d * Wp + Q              # span covering every ky offset per kx shift
        # Three kx-shifted copies reused across the three ky taps; the inner
        # ky*d*Wp slices become vreg-aligned (free) once Wp is padded to a
        # multiple of 128 at production widths.
        hx = [h[:, kx * d:kx * d + L] for kx in range(3)]
        # Three independent per-ky accumulator chains -> ILP on the VALU slots.
        acc_ky = []
        for ky in range(3):
            ro = ky * d * Wp
            a = wd[:, 3 * ky + 0:3 * ky + 1] * hx[0][:, ro:ro + Q]
            a = a + wd[:, 3 * ky + 1:3 * ky + 2] * hx[1][:, ro:ro + Q]
            a = a + wd[:, 3 * ky + 2:3 * ky + 3] * hx[2][:, ro:ro + Q]
            acc_ky.append(a)
        dd = jnp.clip((acc_ky[0] + acc_ky[1]) + acc_ky[2] + b2, 0.0, 6.0)   # (hidden, Q)

        # ---- 1x1 project conv (MXU) + BN bias ------------------------------------
        out = jnp.dot(w3, dd, preferred_element_type=f32, precision=hi) + b3  # (Cout, Q)

        # ---- residual (stride==1 and Cin==Cout) ----------------------------------
        if use_res_connect:
            r0 = pb * Wp + pb           # valid output q=i*Wp+j <-> padded input q+r0
            out = out + xp[:, r0:r0 + Q]

        # Compact the Wp-strided rows into the dense lane-packed output block.
        # TODO(synk): at production Ho fold this into the row-tiled grid so every
        #             store is >=128 dense lanes (matters most on v5e's single vst).
        for i in range(Ho):
            o_ref[0, :, i * Wo:(i + 1) * Wo] = (
                out[:, i * Wp:i * Wp + Wo].astype(o_ref.dtype))
    else:
        # TODO(synk): stride-2 path is a correct per-output-row fallback (strided
        #             lane gathers); not perf-tuned.  Residual never applies here.
        rows = []
        for i in range(Ho):
            acc_ky = []
            for ky in range(3):
                a = None
                for kx in range(3):
                    base = (i * stride + ky * d) * Wp + kx * d
                    row = jax.lax.slice_in_dim(
                        h, base, base + (Wo - 1) * stride + 1, stride, axis=1)
                    term = wd[:, 3 * ky + kx:3 * ky + kx + 1] * row
                    a = term if a is None else a + term
                acc_ky.append(a)
            rows.append(jnp.clip((acc_ky[0] + acc_ky[1]) + acc_ky[2] + b2, 0.0, 6.0))
        dd = jnp.concatenate(rows, axis=1)                      # (hidden, Ho*Wo)
        out = jnp.dot(w3, dd, preferred_element_type=f32, precision=hi) + b3
        o_ref[0] = out.astype(o_ref.dtype)


def inverted_residual_pallas(x_nchw, params, *, stride, dilation):
    """InvertedResidual forward.  Input/output are NCHW (PyTorch layout)."""
    assert stride in (1, 2)
    N, Cin, H, W = x_nchw.shape
    hidden = params["w1f"].shape[0]
    Cout = params["w3f"].shape[0]

    k_eff = 3 + (3 - 1) * (dilation - 1)
    pad_total = k_eff - 1
    pb = pad_total // 2
    Hp, Wp = H + pad_total, W + pad_total
    Ho = (Hp - k_eff) // stride + 1
    Wo = (Wp - k_eff) // stride + 1
    use_res = (stride == 1 and Cin == Cout)

    # Free HBM reshape: NCHW is already contiguous as (N, C, H*W).
    x_flat = x_nchw.reshape(N, Cin, H * W)

    kernel = functools.partial(
        _inverted_residual_kernel,
        H=H, W=W, Hp=Hp, Wp=Wp, Ho=Ho, Wo=Wo, pb=pb,
        stride=stride, dilation=dilation, use_res_connect=use_res)

    const = lambda shape: pl.BlockSpec(shape, lambda n: (0, 0))
    out_flat = pl.pallas_call(
        kernel,
        out_shape=jax.ShapeDtypeStruct((N, Cout, Ho * Wo), x_nchw.dtype),
        grid_spec=pltpu.PrefetchScalarGridSpec(
            num_scalar_prefetch=0,
            grid=(N,),                       # N=2 -> two 'parallel' steps (v7x 2 TCs)
            in_specs=[
                pl.BlockSpec((1, Cin, H * W), lambda n: (n, 0, 0)),   # x (read once)
                const((hidden, Cin)),    # w1f  (BN1 scale folded)
                const((hidden, 1)),      # b1f
                const((hidden, 9)),      # wdf  (BN2 scale folded)
                const((hidden, 1)),      # b2f
                const((Cout, hidden)),   # w3f  (BN3 scale folded)
                const((Cout, 1)),        # b3f
            ],
            out_specs=pl.BlockSpec((1, Cout, Ho * Wo), lambda n: (n, 0, 0)),
            scratch_shapes=[pltpu.VMEM((Cin, Hp * Wp), jnp.float32)],
        ),
        compiler_params=pltpu.CompilerParams(
            dimension_semantics=("parallel",)),
    )(x_flat, params["w1f"], params["b1f"], params["wdf"],
      params["b2f"], params["w3f"], params["b3f"])

    # Free HBM reshape back to NCHW.
    return out_flat.reshape(N, Cout, Ho, Wo)


# ----------------------------- parameters & reference ---------------------------

def make_raw_params(key, inp, oup, expand_ratio):
    """Deterministic synthetic parameters matching the PyTorch module's shapes."""
    hidden = int(round(inp * expand_ratio))
    ks = jax.random.split(key, 15)
    eps = 1e-5

    w1 = 0.3 * jax.random.normal(ks[0], (hidden, inp), jnp.float32)   # conv1 1x1
    wd = 0.3 * jax.random.normal(ks[1], (hidden, 3, 3), jnp.float32)  # depthwise 3x3
    w3 = 0.3 * jax.random.normal(ks[2], (oup, hidden), jnp.float32)   # conv3 1x1

    def bn_fold(kg, kb, km, kv, c):
        gamma = 1.0 + 0.1 * jax.random.normal(kg, (c,), jnp.float32)
        beta = 0.1 * jax.random.normal(kb, (c,), jnp.float32)
        mean = 0.1 * jax.random.normal(km, (c,), jnp.float32)
        var = 1.0 + 0.5 * jax.random.uniform(kv, (c,), jnp.float32)
        scale = gamma / jnp.sqrt(var + eps)
        bias = beta - mean * scale
        return scale, bias

    s1, b1 = bn_fold(ks[3], ks[4], ks[5], ks[6], hidden)
    s2, b2 = bn_fold(ks[7], ks[8], ks[9], ks[10], hidden)
    s3, b3 = bn_fold(ks[11], ks[12], ks[13], ks[14], oup)
    return dict(w1=w1, wd=wd, w3=w3, s1=s1, b1=b1, s2=s2, b2=b2, s3=s3, b3=b3)


def fold_params(raw):
    """Fold eval-mode BN scales into the conv weights (host-side, done once)."""
    hidden = raw["w1"].shape[0]
    w1f = raw["w1"] * raw["s1"][:, None]                               # (hidden, Cin)
    wdf = (raw["wd"] * raw["s2"][:, None, None]).reshape(hidden, 9)    # taps ky*3+kx
    w3f = raw["w3"] * raw["s3"][:, None]                               # (Cout, hidden)
    return dict(w1f=w1f, b1f=raw["b1"][:, None],
                wdf=wdf, b2f=raw["b2"][:, None],
                w3f=w3f, b3f=raw["b3"][:, None])


def reference_forward(x, raw, *, stride, dilation):
    """Pure-JAX NCHW reference with unfolded conv->BN->ReLU6 structure."""
    hi = jax.lax.Precision.HIGHEST
    k_eff = 3 + (3 - 1) * (dilation - 1)
    pt = k_eff - 1
    pb_, pe_ = pt // 2, pt - pt // 2
    xpad = jnp.pad(x, ((0, 0), (0, 0), (pb_, pe_), (pb_, pe_)))

    def bn(t, s, b):
        return t * s[None, :, None, None] + b[None, :, None, None]

    h = jnp.einsum("oc,nchw->nohw", raw["w1"], xpad, precision=hi)
    h = jnp.clip(bn(h, raw["s1"], raw["b1"]), 0.0, 6.0)

    hidden = raw["w1"].shape[0]
    hd = jax.lax.conv_general_dilated(
        h, raw["wd"][:, None], window_strides=(stride, stride), padding="VALID",
        rhs_dilation=(dilation, dilation),
        dimension_numbers=("NCHW", "OIHW", "NCHW"),
        feature_group_count=hidden, precision=hi)
    hd = jnp.clip(bn(hd, raw["s2"], raw["b2"]), 0.0, 6.0)

    out = jnp.einsum("oc,nchw->nohw", raw["w3"], hd, precision=hi)
    out = bn(out, raw["s3"], raw["b3"])
    if stride == 1 and x.shape[1] == out.shape[1]:
        out = x + out
    return out


if __name__ == "__main__":
    # Module config: inp=oup=4, stride=1, dilation=1, expand_ratio=6
    #   -> hidden_dim=24, use_res_connect=True
    inp, oup, stride, dilation, expand_ratio = 4, 4, 1, 1, 6
    N, H, W = 2, 16, 16

    key = jax.random.PRNGKey(0)
    kx, kp = jax.random.split(key)
    x = jax.random.normal(kx, (N, inp, H, W), jnp.float32)  # NCHW like PyTorch

    raw = make_raw_params(kp, inp, oup, expand_ratio)
    params = fold_params(raw)

    out = inverted_residual_pallas(x, params, stride=stride, dilation=dilation)
    out = jax.block_until_ready(out)

    ref = jax.block_until_ready(
        reference_forward(x, raw, stride=stride, dilation=dilation))

    assert out.shape == (N, oup, H, W), out.shape
    np.testing.assert_allclose(np.asarray(out), np.asarray(ref), rtol=2e-3, atol=2e-3)
    print("KERNEL_OK")
</pallas_src>

<mosaic_0001>
module attributes {stable_mosaic.version = 11 : i64} {
  func.func @_inverted_residual_kernel(%arg0: i32, %arg1: memref<1x4x256xf32, #tpu.memory_space<vmem>>, %arg2: memref<24x4xf32, #tpu.memory_space<vmem>>, %arg3: memref<24x1xf32, #tpu.memory_space<vmem>>, %arg4: memref<24x9xf32, #tpu.memory_space<vmem>>, %arg5: memref<24x1xf32, #tpu.memory_space<vmem>>, %arg6: memref<4x24xf32, #tpu.memory_space<vmem>>, %arg7: memref<4x1xf32, #tpu.memory_space<vmem>>, %arg8: memref<1x4x256xf32, #tpu.memory_space<vmem>>, %arg9: memref<4x324xf32, #tpu.memory_space<vmem>>) attributes {dimension_semantics = [#tpu.dimension_semantics<parallel>], iteration_bounds = array<i64: 2>, scalar_prefetch = 0 : i64, scratch_operands = 1 : i64, tpu.core_type = #tpu.core_type<tc>, window_params = [{transform_indices = @transform_0, window_bounds = array<i64: 1, 4, 256>}, {pipeline_mode = #tpu.pipeline_mode<synchronous>, transform_indices = @transform_1, window_bounds = array<i64: 24, 4>}, {pipeline_mode = #tpu.pipeline_mode<synchronous>, transform_indices = @transform_2, window_bounds = array<i64: 24, 1>}, {pipeline_mode = #tpu.pipeline_mode<synchronous>, transform_indices = @transform_3, window_bounds = array<i64: 24, 9>}, {pipeline_mode = #tpu.pipeline_mode<synchronous>, transform_indices = @transform_4, window_bounds = array<i64: 24, 1>}, {pipeline_mode = #tpu.pipeline_mode<synchronous>, transform_indices = @transform_5, window_bounds = array<i64: 4, 24>}, {pipeline_mode = #tpu.pipeline_mode<synchronous>, transform_indices = @transform_6, window_bounds = array<i64: 4, 1>}, {transform_indices = @transform_7, window_bounds = array<i64: 1, 4, 256>}]} {
    %c0 = arith.constant 0 : index
    %c0_0 = arith.constant 0 : index
    %c0_1 = arith.constant 0 : index
    %0 = vector.load %arg1[%c0, %c0_0, %c0_1] : memref<1x4x256xf32, #tpu.memory_space<vmem>>, vector<1x4x256xf32>
    %1 = vector.shape_cast %0 : vector<1x4x256xf32> to vector<4x256xf32>
    %cst = arith.constant 0.000000e+00 : f32
    %2 = vector.broadcast %cst : f32 to vector<4x324xf32>
    %c0_2 = arith.constant 0 : index
    %c0_3 = arith.constant 0 : index
    %3 = vector.load %arg9[%c0_2, %c0_3] : memref<4x324xf32, #tpu.memory_space<vmem>>, vector<4x324xf32>
    tpu.vector_store %arg9[%c0_2, %c0_3], %2 {strides = array<i32>} : memref<4x324xf32, #tpu.memory_space<vmem>>, vector<4x324xf32>,
    %4 = vector.extract_strided_slice %1 {offsets = [0, 0], sizes = [4, 16], strides = [1, 1]} : vector<4x256xf32> to vector<4x16xf32>
    %c0_4 = arith.constant 0 : index
    %c19 = arith.constant 19 : index
    %5 = vector.load %arg9[%c0_4, %c19] : memref<4x324xf32, #tpu.memory_space<vmem>>, vector<4x16xf32>
    tpu.vector_store %arg9[%c0_4, %c19], %4 {strides = array<i32>} : memref<4x324xf32, #tpu.memory_space<vmem>>, vector<4x16xf32>,
    %6 = vector.extract_strided_slice %1 {offsets = [0, 16], sizes = [4, 16], strides = [1, 1]} : vector<4x256xf32> to vector<4x16xf32>
    %c0_5 = arith.constant 0 : index
    %c37 = arith.constant 37 : index
    %7 = vector.load %arg9[%c0_5, %c37] : memref<4x324xf32, #tpu.memory_space<vmem>>, vector<4x16xf32>
    tpu.vector_store %arg9[%c0_5, %c37], %6 {strides = array<i32>} : memref<4x324xf32, #tpu.memory_space<vmem>>, vector<4x16xf32>,
    %8 = vector.extract_strided_slice %1 {offsets = [0, 32], sizes = [4, 16], strides = [1, 1]} : vector<4x256xf32> to vector<4x16xf32>
    %c0_6 = arith.constant 0 : index
    %c55 = arith.constant 55 : index
    %9 = vector.load %arg9[%c0_6, %c55] : memref<4x324xf32, #tpu.memory_space<vmem>>, vector<4x16xf32>
    tpu.vector_store %arg9[%c0_6, %c55], %8 {strides = array<i32>} : memref<4x324xf32, #tpu.memory_space<vmem>>, vector<4x16xf32>,
    %10 = vector.extract_strided_slice %1 {offsets = [0, 48], sizes = [4, 16], strides = [1, 1]} : vector<4x256xf32> to vector<4x16xf32>
    %c0_7 = arith.constant 0 : index
    %c73 = arith.constant 73 : index
    %11 = vector.load %arg9[%c0_7, %c73] : memref<4x324xf32, #tpu.memory_space<vmem>>, vector<4x16xf32>
    tpu.vector_store %arg9[%c0_7, %c73], %10 {strides = array<i32>} : memref<4x324xf32, #tpu.memory_space<vmem>>, vector<4x16xf32>,
    %12 = vector.extract_strided_slice %1 {offsets = [0, 64], sizes = [4, 16], strides = [1, 1]} : vector<4x256xf32> to vector<4x16xf32>
    %c0_8 = arith.constant 0 : index
    %c91 = arith.constant 91 : index
    %13 = vector.load %arg9[%c0_8, %c91] : memref<4x324xf32, #tpu.memory_space<vmem>>, vector<4x16xf32>
    tpu.vector_store %arg9[%c0_8, %c91], %12 {strides = array<i32>} : memref<4x324xf32, #tpu.memory_space<vmem>>, vector<4x16xf32>,
    %14 = vector.extract_strided_slice %1 {offsets = [0, 80], sizes = [4, 16], strides = [1, 1]} : vector<4x256xf32> to vector<4x16xf32>
    %c0_9 = arith.constant 0 : index
    %c109 = arith.constant 109 : index
    %15 = vector.load %arg9[%c0_9, %c109] : memref<4x324xf32, #tpu.memory_space<vmem>>, vector<4x16xf32>
    tpu.vector_store %arg9[%c0_9, %c109], %14 {strides = array<i32>} : memref<4x324xf32, #tpu.memory_space<vmem>>, vector<4x16xf32>,
    %16 = vector.extract_strided_slice %1 {offsets = [0, 96], sizes = [4, 16], strides = [1, 1]} : vector<4x256xf32> to vector<4x16xf32>
    %c0_10 = arith.constant 0 : index
    %c127 = arith.constant 127 : index
    %17 = vector.load %arg9[%c0_10, %c127] : memref<4x324xf32, #tpu.memory_space<vmem>>, vector<4x16xf32>
    tpu.vector_store %arg9[%c0_10, %c127], %16 {strides = array<i32>} : memref<4x324xf32, #tpu.memory_space<vmem>>, vector<4x16xf32>,
    %18 = vector.extract_strided_slice %1 {offsets = [0, 112], sizes = [4, 16], strides = [1, 1]} : vector<4x256xf32> to vector<4x16xf32>
    %c0_11 = arith.constant 0 : index
    %c145 = arith.constant 145 : index
    %19 = vector.load %arg9[%c0_11, %c145] : memref<4x324xf32, #tpu.memory_space<vmem>>, vector<4x16xf32>
    tpu.vector_store %arg9[%c0_11, %c145], %18 {strides = array<i32>} : memref<4x324xf32, #tpu.memory_space<vmem>>, vector<4x16xf32>,
    %20 = vector.extract_strided_slice %1 {offsets = [0, 128], sizes = [4, 16], strides = [1, 1]} : vector<4x256xf32> to vector<4x16xf32>
    %c0_12 = arith.constant 0 : index
    %c163 = arith.constant 163 : index
    %21 = vector.load %arg9[%c0_12, %c163] : memref<4x324xf32, #tpu.memory_space<vmem>>, vector<4x16xf32>
    tpu.vector_store %arg9[%c0_12, %c163], %20 {strides = array<i32>} : memref<4x324xf32, #tpu.memory_space<vmem>>, vector<4x16xf32>,
    %22 = vector.extract_strided_slice %1 {offsets = [0, 144], sizes = [4, 16], strides = [1, 1]} : vector<4x256xf32> to vector<4x16xf32>
    %c0_13 = arith.constant 0 : index
    %c181 = arith.constant 181 : index
    %23 = vector.load %arg9[%c0_13, %c181] : memref<4x324xf32, #tpu.memory_space<vmem>>, vector<4x16xf32>
    tpu.vector_store %arg9[%c0_13, %c181], %22 {strides = array<i32>} : memref<4x324xf32, #tpu.memory_space<vmem>>, vector<4x16xf32>,
    %24 = vector.extract_strided_slice %1 {offsets = [0, 160], sizes = [4, 16], strides = [1, 1]} : vector<4x256xf32> to vector<4x16xf32>
    %c0_14 = arith.constant 0 : index
    %c199 = arith.constant 199 : index
    %25 = vector.load %arg9[%c0_14, %c199] : memref<4x324xf32, #tpu.memory_space<vmem>>, vector<4x16xf32>
    tpu.vector_store %arg9[%c0_14, %c199], %24 {strides = array<i32>} : memref<4x324xf32, #tpu.memory_space<vmem>>, vector<4x16xf32>,
    %26 = vector.extract_strided_slice %1 {offsets = [0, 176], sizes = [4, 16], strides = [1, 1]} : vector<4x256xf32> to vector<4x16xf32>
    %c0_15 = arith.constant 0 : index
    %c217 = arith.constant 217 : index
    %27 = vector.load %arg9[%c0_15, %c217] : memref<4x324xf32, #tpu.memory_space<vmem>>, vector<4x16xf32>
    tpu.vector_store %arg9[%c0_15, %c217], %26 {strides = array<i32>} : memref<4x324xf32, #tpu.memory_space<vmem>>, vector<4x16xf32>,
    %28 = vector.extract_strided_slice %1 {offsets = [0, 192], sizes = [4, 16], strides = [1, 1]} : vector<4x256xf32> to vector<4x16xf32>
    %c0_16 = arith.constant 0 : index
    %c235 = arith.constant 235 : index
    %29 = vector.load %arg9[%c0_16, %c235] : memref<4x324xf32, #tpu.memory_space<vmem>>, vector<4x16xf32>
    tpu.vector_store %arg9[%c0_16, %c235], %28 {strides = array<i32>} : memref<4x324xf32, #tpu.memory_space<vmem>>, vector<4x16xf32>,
    %30 = vector.extract_strided_slice %1 {offsets = [0, 208], sizes = [4, 16], strides = [1, 1]} : vector<4x256xf32> to vector<4x16xf32>
    %c0_17 = arith.constant 0 : index
    %c253 = arith.constant 253 : index
    %31 = vector.load %arg9[%c0_17, %c253] : memref<4x324xf32, #tpu.memory_space<vmem>>, vector<4x16xf32>
    tpu.vector_store %arg9[%c0_17, %c253], %30 {strides = array<i32>} : memref<4x324xf32, #tpu.memory_space<vmem>>, vector<4x16xf32>,
    %32 = vector.extract_strided_slice %1 {offsets = [0, 224], sizes = [4, 16], strides = [1, 1]} : vector<4x256xf32> to vector<4x16xf32>
    %c0_18 = arith.constant 0 : index
    %c271 = arith.constant 271 : index
    %33 = vector.load %arg9[%c0_18, %c271] : memref<4x324xf32, #tpu.memory_space<vmem>>, vector<4x16xf32>
    tpu.vector_store %arg9[%c0_18, %c271], %32 {strides = array<i32>} : memref<4x324xf32, #tpu.memory_space<vmem>>, vector<4x16xf32>,
    %34 = vector.extract_strided_slice %1 {offsets = [0, 240], sizes = [4, 16], strides = [1, 1]} : vector<4x256xf32> to vector<4x16xf32>
    %c0_19 = arith.constant 0 : index
    %c289 = arith.constant 289 : index
    %35 = vector.load %arg9[%c0_19, %c289] : memref<4x324xf32, #tpu.memory_space<vmem>>, vector<4x16xf32>
    tpu.vector_store %arg9[%c0_19, %c289], %34 {strides = array<i32>} : memref<4x324xf32, #tpu.memory_space<vmem>>, vector<4x16xf32>,
    %c0_20 = arith.constant 0 : index
    %c0_21 = arith.constant 0 : index
    %36 = vector.load %arg9[%c0_20, %c0_21] : memref<4x324xf32, #tpu.memory_space<vmem>>, vector<4x324xf32>
    %c0_22 = arith.constant 0 : index
    %c0_23 = arith.constant 0 : index
    %37 = vector.load %arg2[%c0_22, %c0_23] : memref<24x4xf32, #tpu.memory_space<vmem>>, vector<24x4xf32>
    %c0_24 = arith.constant 0 : index
    %c0_25 = arith.constant 0 : index
    %38 = vector.load %arg3[%c0_24, %c0_25] : memref<24x1xf32, #tpu.memory_space<vmem>>, vector<24x1xf32>
    %c0_26 = arith.constant 0 : index
    %c0_27 = arith.constant 0 : index
    %39 = vector.load %arg4[%c0_26, %c0_27] : memref<24x9xf32, #tpu.memory_space<vmem>>, vector<24x9xf32>
    %c0_28 = arith.constant 0 : index
    %c0_29 = arith.constant 0 : index
    %40 = vector.load %arg5[%c0_28, %c0_29] : memref<24x1xf32, #tpu.memory_space<vmem>>, vector<24x1xf32>
    %c0_30 = arith.constant 0 : index
    %c0_31 = arith.constant 0 : index
    %41 = vector.load %arg6[%c0_30, %c0_31] : memref<4x24xf32, #tpu.memory_space<vmem>>, vector<4x24xf32>
    %c0_32 = arith.constant 0 : index
    %c0_33 = arith.constant 0 : index
    %42 = vector.load %arg7[%c0_32, %c0_33] : memref<4x1xf32, #tpu.memory_space<vmem>>, vector<4x1xf32>
    %cst_34 = arith.constant dense<0.000000e+00> : vector<24x324xf32>
    %43 = tpu.matmul %37, %36, %cst_34 {dimension_numbers = #tpu.dot_dimension_numbers<[1], [0], [0], [1], [0, 0, 1, 1], [], []>, precision = #tpu.contract_precision<fp32>} : vector<24x4xf32>, vector<4x324xf32>, vector<24x324xf32> -> vector<24x324xf32>
    %44 = vector.broadcast %38 : vector<24x1xf32> to vector<24x324xf32>
    %45 = arith.addf %43, %44 : vector<24x324xf32>
    %cst_35 = arith.constant 0.000000e+00 : f32
    %cst_36 = arith.constant 6.000000e+00 : f32
    %46 = vector.broadcast %cst_35 : f32 to vector<24x324xf32>
    %47 = arith.maximumf %46, %45 : vector<24x324xf32>
    %48 = vector.broadcast %cst_36 : f32 to vector<24x324xf32>
    %49 = arith.minimumf %48, %47 : vector<24x324xf32>
    %50 = vector.extract_strided_slice %49 {offsets = [0, 0], sizes = [24, 322], strides = [1, 1]} : vector<24x324xf32> to vector<24x322xf32>
    %51 = vector.extract_strided_slice %49 {offsets = [0, 1], sizes = [24, 322], strides = [1, 1]} : vector<24x324xf32> to vector<24x322xf32>
    %52 = vector.extract_strided_slice %49 {offsets = [0, 2], sizes = [24, 322], strides = [1, 1]} : vector<24x324xf32> to vector<24x322xf32>
    %53 = vector.extract_strided_slice %39 {offsets = [0, 0], sizes = [24, 1], strides = [1, 1]} : vector<24x9xf32> to vector<24x1xf32>
    %54 = vector.extract_strided_slice %50 {offsets = [0, 0], sizes = [24, 286], strides = [1, 1]} : vector<24x322xf32> to vector<24x286xf32>
    %55 = vector.broadcast %53 : vector<24x1xf32> to vector<24x286xf32>
    %56 = arith.mulf %55, %54 : vector<24x286xf32>
    %57 = vector.extract_strided_slice %39 {offsets = [0, 1], sizes = [24, 1], strides = [1, 1]} : vector<24x9xf32> to vector<24x1xf32>
    %58 = vector.extract_strided_slice %51 {offsets = [0, 0], sizes = [24, 286], strides = [1, 1]} : vector<24x322xf32> to vector<24x286xf32>
    %59 = vector.broadcast %57 : vector<24x1xf32> to vector<24x286xf32>
    %60 = arith.mulf %59, %58 : vector<24x286xf32>
    %61 = arith.addf %56, %60 : vector<24x286xf32>
    %62 = vector.extract_strided_slice %39 {offsets = [0, 2], sizes = [24, 1], strides = [1, 1]} : vector<24x9xf32> to vector<24x1xf32>
    %63 = vector.extract_strided_slice %52 {offsets = [0, 0], sizes = [24, 286], strides = [1, 1]} : vector<24x322xf32> to vector<24x286xf32>
    %64 = vector.broadcast %62 : vector<24x1xf32> to vector<24x286xf32>
    %65 = arith.mulf %64, %63 : vector<24x286xf32>
    %66 = arith.addf %61, %65 : vector<24x286xf32>
    %67 = vector.extract_strided_slice %39 {offsets = [0, 3], sizes = [24, 1], strides = [1, 1]} : vector<24x9xf32> to vector<24x1xf32>
    %68 = vector.extract_strided_slice %50 {offsets = [0, 18], sizes = [24, 286], strides = [1, 1]} : vector<24x322xf32> to vector<24x286xf32>
    %69 = vector.broadcast %67 : vector<24x1xf32> to vector<24x286xf32>
    %70 = arith.mulf %69, %68 : vector<24x286xf32>
    %71 = vector.extract_strided_slice %39 {offsets = [0, 4], sizes = [24, 1], strides = [1, 1]} : vector<24x9xf32> to vector<24x1xf32>
    %72 = vector.extract_strided_slice %51 {offsets = [0, 18], sizes = [24, 286], strides = [1, 1]} : vector<24x322xf32> to vector<24x286xf32>
    %73 = vector.broadcast %71 : vector<24x1xf32> to vector<24x286xf32>
    %74 = arith.mulf %73, %72 : vector<24x286xf32>
    %75 = arith.addf %70, %74 : vector<24x286xf32>
    %76 = vector.extract_strided_slice %39 {offsets = [0, 5], sizes = [24, 1], strides = [1, 1]} : vector<24x9xf32> to vector<24x1xf32>
    %77 = vector.extract_strided_slice %52 {offsets = [0, 18], sizes = [24, 286], strides = [1, 1]} : vector<24x322xf32> to vector<24x286xf32>
    %78 = vector.broadcast %76 : vector<24x1xf32> to vector<24x286xf32>
    %79 = arith.mulf %78, %77 : vector<24x286xf32>
    %80 = arith.addf %75, %79 : vector<24x286xf32>
    %81 = vector.extract_strided_slice %39 {offsets = [0, 6], sizes = [24, 1], strides = [1, 1]} : vector<24x9xf32> to vector<24x1xf32>
    %82 = vector.extract_strided_slice %50 {offsets = [0, 36], sizes = [24, 286], strides = [1, 1]} : vector<24x322xf32> to vector<24x286xf32>
    %83 = vector.broadcast %81 : vector<24x1xf32> to vector<24x286xf32>
    %84 = arith.mulf %83, %82 : vector<24x286xf32>
    %85 = vector.extract_strided_slice %39 {offsets = [0, 7], sizes = [24, 1], strides = [1, 1]} : vector<24x9xf32> to vector<24x1xf32>
    %86 = vector.extract_strided_slice %51 {offsets = [0, 36], sizes = [24, 286], strides = [1, 1]} : vector<24x322xf32> to vector<24x286xf32>
    %87 = vector.broadcast %85 : vector<24x1xf32> to vector<24x286xf32>
    %88 = arith.mulf %87, %86 : vector<24x286xf32>
    %89 = arith.addf %84, %88 : vector<24x286xf32>
    %90 = vector.extract_strided_slice %39 {offsets = [0, 8], sizes = [24, 1], strides = [1, 1]} : vector<24x9xf32> to vector<24x1xf32>
    %91 = vector.extract_strided_slice %52 {offsets = [0, 36], sizes = [24, 286], strides = [1, 1]} : vector<24x322xf32> to vector<24x286xf32>
    %92 = vector.broadcast %90 : vector<24x1xf32> to vector<24x286xf32>
    %93 = arith.mulf %92, %91 : vector<24x286xf32>
    %94 = arith.addf %89, %93 : vector<24x286xf32>
    %95 = arith.addf %66, %80 : vector<24x286xf32>
    %96 = arith.addf %95, %94 : vector<24x286xf32>
    %97 = vector.broadcast %40 : vector<24x1xf32> to vector<24x286xf32>
    %98 = arith.addf %96, %97 : vector<24x286xf32>
    %cst_37 = arith.constant 0.000000e+00 : f32
    %cst_38 = arith.constant 6.000000e+00 : f32
    %99 = vector.broadcast %cst_37 : f32 to vector<24x286xf32>
    %100 = arith.maximumf %99, %98 : vector<24x286xf32>
    %101 = vector.broadcast %cst_38 : f32 to vector<24x286xf32>
    %102 = arith.minimumf %101, %100 : vector<24x286xf32>
    %cst_39 = arith.constant dense<0.000000e+00> : vector<4x286xf32>
    %103 = tpu.matmul %41, %102, %cst_39 {dimension_numbers = #tpu.dot_dimension_numbers<[1], [0], [0], [1], [0, 0, 1, 1], [], []>, precision = #tpu.contract_precision<fp32>} : vector<4x24xf32>, vector<24x286xf32>, vector<4x286xf32> -> vector<4x286xf32>
    %104 = vector.broadcast %42 : vector<4x1xf32> to vector<4x286xf32>
    %105 = arith.addf %103, %104 : vector<4x286xf32>
    %106 = vector.extract_strided_slice %36 {offsets = [0, 19], sizes = [4, 286], strides = [1, 1]} : vector<4x324xf32> to vector<4x286xf32>
    %107 = arith.addf %105, %106 : vector<4x286xf32>
    %108 = vector.extract_strided_slice %107 {offsets = [0, 0], sizes = [4, 16], strides = [1, 1]} : vector<4x286xf32> to vector<4x16xf32>
    %c0_40 = arith.constant 0 : index
    %c0_41 = arith.constant 0 : index
    %c0_42 = arith.constant 0 : index
    %109 = vector.load %arg8[%c0_40, %c0_41, %c0_42] : memref<1x4x256xf32, #tpu.memory_space<vmem>>, vector<1x4x16xf32>
    %110 = vector.shape_cast %109 : vector<1x4x16xf32> to vector<4x16xf32>
    %111 = vector.shape_cast %108 : vector<4x16xf32> to vector<1x4x16xf32>
    tpu.vector_store %arg8[%c0_40, %c0_41, %c0_42], %111 {strides = array<i32>} : memref<1x4x256xf32, #tpu.memory_space<vmem>>, vector<1x4x16xf32>,
    %112 = vector.extract_strided_slice %107 {offsets = [0, 18], sizes = [4, 16], strides = [1, 1]} : vector<4x286xf32> to vector<4x16xf32>
    %c0_43 = arith.constant 0 : index
    %c0_44 = arith.constant 0 : index
    %c16 = arith.constant 16 : index
    %113 = vector.load %arg8[%c0_43, %c0_44, %c16] : memref<1x4x256xf32, #tpu.memory_space<vmem>>, vector<1x4x16xf32>
    %114 = vector.shape_cast %113 : vector<1x4x16xf32> to vector<4x16xf32>
    %115 = vector.shape_cast %112 : vector<4x16xf32> to vector<1x4x16xf32>
    tpu.vector_store %arg8[%c0_43, %c0_44, %c16], %115 {strides = array<i32>} : memref<1x4x256xf32, #tpu.memory_space<vmem>>, vector<1x4x16xf32>,
    %116 = vector.extract_strided_slice %107 {offsets = [0, 36], sizes = [4, 16], strides = [1, 1]} : vector<4x286xf32> to vector<4x16xf32>
    %c0_45 = arith.constant 0 : index
    %c0_46 = arith.constant 0 : index
    %c32 = arith.constant 32 : index
    %117 = vector.load %arg8[%c0_45, %c0_46, %c32] : memref<1x4x256xf32, #tpu.memory_space<vmem>>, vector<1x4x16xf32>
    %118 = vector.shape_cast %117 : vector<1x4x16xf32> to vector<4x16xf32>
    %119 = vector.shape_cast %116 : vector<4x16xf32> to vector<1x4x16xf32>
    tpu.vector_store %arg8[%c0_45, %c0_46, %c32], %119 {strides = array<i32>} : memref<1x4x256xf32, #tpu.memory_space<vmem>>, vector<1x4x16xf32>,
    %120 = vector.extract_strided_slice %107 {offsets = [0, 54], sizes = [4, 16], strides = [1, 1]} : vector<4x286xf32> to vector<4x16xf32>
    %c0_47 = arith.constant 0 : index
    %c0_48 = arith.constant 0 : index
    %c48 = arith.constant 48 : index
    %121 = vector.load %arg8[%c0_47, %c0_48, %c48] : memref<1x4x256xf32, #tpu.memory_space<vmem>>, vector<1x4x16xf32>
    %122 = vector.shape_cast %121 : vector<1x4x16xf32> to vector<4x16xf32>
    %123 = vector.shape_cast %120 : vector<4x16xf32> to vector<1x4x16xf32>
    tpu.vector_store %arg8[%c0_47, %c0_48, %c48], %123 {strides = array<i32>} : memref<1x4x256xf32, #tpu.memory_space<vmem>>, vector<1x4x16xf32>,
    %124 = vector.extract_strided_slice %107 {offsets = [0, 72], sizes = [4, 16], strides = [1, 1]} : vector<4x286xf32> to vector<4x16xf32>
    %c0_49 = arith.constant 0 : index
    %c0_50 = arith.constant 0 : index
    %c64 = arith.constant 64 : index
    %125 = vector.load %arg8[%c0_49, %c0_50, %c64] : memref<1x4x256xf32, #tpu.memory_space<vmem>>, vector<1x4x16xf32>
    %126 = vector.shape_cast %125 : vector<1x4x16xf32> to vector<4x16xf32>
    %127 = vector.shape_cast %124 : vector<4x16xf32> to vector<1x4x16xf32>
    tpu.vector_store %arg8[%c0_49, %c0_50, %c64], %127 {strides = array<i32>} : memref<1x4x256xf32, #tpu.memory_space<vmem>>, vector<1x4x16xf32>,
    %128 = vector.extract_strided_slice %107 {offsets = [0, 90], sizes = [4, 16], strides = [1, 1]} : vector<4x286xf32> to vector<4x16xf32>
    %c0_51 = arith.constant 0 : index
    %c0_52 = arith.constant 0 : index
    %c80 = arith.constant 80 : index
    %129 = vector.load %arg8[%c0_51, %c0_52, %c80] : memref<1x4x256xf32, #tpu.memory_space<vmem>>, vector<1x4x16xf32>
    %130 = vector.shape_cast %129 : vector<1x4x16xf32> to vector<4x16xf32>
    %131 = vector.shape_cast %128 : vector<4x16xf32> to vector<1x4x16xf32>
    tpu.vector_store %arg8[%c0_51, %c0_52, %c80], %131 {strides = array<i32>} : memref<1x4x256xf32, #tpu.memory_space<vmem>>, vector<1x4x16xf32>,
    %132 = vector.extract_strided_slice %107 {offsets = [0, 108], sizes = [4, 16], strides = [1, 1]} : vector<4x286xf32> to vector<4x16xf32>
    %c0_53 = arith.constant 0 : index
    %c0_54 = arith.constant 0 : index
    %c96 = arith.constant 96 : index
    %133 = vector.load %arg8[%c0_53, %c0_54, %c96] : memref<1x4x256xf32, #tpu.memory_space<vmem>>, vector<1x4x16xf32>
    %134 = vector.shape_cast %133 : vector<1x4x16xf32> to vector<4x16xf32>
    %135 = vector.shape_cast %132 : vector<4x16xf32> to vector<1x4x16xf32>
    tpu.vector_store %arg8[%c0_53, %c0_54, %c96], %135 {strides = array<i32>} : memref<1x4x256xf32, #tpu.memory_space<vmem>>, vector<1x4x16xf32>,
    %136 = vector.extract_strided_slice %107 {offsets = [0, 126], sizes = [4, 16], strides = [1, 1]} : vector<4x286xf32> to vector<4x16xf32>
    %c0_55 = arith.constant 0 : index
    %c0_56 = arith.constant 0 : index
    %c112 = arith.constant 112 : index
    %137 = vector.load %arg8[%c0_55, %c0_56, %c112] : memref<1x4x256xf32, #tpu.memory_space<vmem>>, vector<1x4x16xf32>
    %138 = vector.shape_cast %137 : vector<1x4x16xf32> to vector<4x16xf32>
    %139 = vector.shape_cast %136 : vector<4x16xf32> to vector<1x4x16xf32>
    tpu.vector_store %arg8[%c0_55, %c0_56, %c112], %139 {strides = array<i32>} : memref<1x4x256xf32, #tpu.memory_space<vmem>>, vector<1x4x16xf32>,
    %140 = vector.extract_strided_slice %107 {offsets = [0, 144], sizes = [4, 16], strides = [1, 1]} : vector<4x286xf32> to vector<4x16xf32>
    %c0_57 = arith.constant 0 : index
    %c0_58 = arith.constant 0 : index
    %c128 = arith.constant 128 : index
    %141 = vector.load %arg8[%c0_57, %c0_58, %c128] : memref<1x4x256xf32, #tpu.memory_space<vmem>>, vector<1x4x16xf32>
    %142 = vector.shape_cast %141 : vector<1x4x16xf32> to vector<4x16xf32>
    %143 = vector.shape_cast %140 : vector<4x16xf32> to vector<1x4x16xf32>
    tpu.vector_store %arg8[%c0_57, %c0_58, %c128], %143 {strides = array<i32>} : memref<1x4x256xf32, #tpu.memory_space<vmem>>, vector<1x4x16xf32>,
    %144 = vector.extract_strided_slice %107 {offsets = [0, 162], sizes = [4, 16], strides = [1, 1]} : vector<4x286xf32> to vector<4x16xf32>
    %c0_59 = arith.constant 0 : index
    %c0_60 = arith.constant 0 : index
    %c144 = arith.constant 144 : index
    %145 = vector.load %arg8[%c0_59, %c0_60, %c144] : memref<1x4x256xf32, #tpu.memory_space<vmem>>, vector<1x4x16xf32>
    %146 = vector.shape_cast %145 : vector<1x4x16xf32> to vector<4x16xf32>
    %147 = vector.shape_cast %144 : vector<4x16xf32> to vector<1x4x16xf32>
    tpu.vector_store %arg8[%c0_59, %c0_60, %c144], %147 {strides = array<i32>} : memref<1x4x256xf32, #tpu.memory_space<vmem>>, vector<1x4x16xf32>,
    %148 = vector.extract_strided_slice %107 {offsets = [0, 180], sizes = [4, 16], strides = [1, 1]} : vector<4x286xf32> to vector<4x16xf32>
    %c0_61 = arith.constant 0 : index
    %c0_62 = arith.constant 0 : index
    %c160 = arith.constant 160 : index
    %149 = vector.load %arg8[%c0_61, %c0_62, %c160] : memref<1x4x256xf32, #tpu.memory_space<vmem>>, vector<1x4x16xf32>
    %150 = vector.shape_cast %149 : vector<1x4x16xf32> to vector<4x16xf32>
    %151 = vector.shape_cast %148 : vector<4x16xf32> to vector<1x4x16xf32>
    tpu.vector_store %arg8[%c0_61, %c0_62, %c160], %151 {strides = array<i32>} : memref<1x4x256xf32, #tpu.memory_space<vmem>>, vector<1x4x16xf32>,
    %152 = vector.extract_strided_slice %107 {offsets = [0, 198], sizes = [4, 16], strides = [1, 1]} : vector<4x286xf32> to vector<4x16xf32>
    %c0_63 = arith.constant 0 : index
    %c0_64 = arith.constant 0 : index
    %c176 = arith.constant 176 : index
    %153 = vector.load %arg8[%c0_63, %c0_64, %c176] : memref<1x4x256xf32, #tpu.memory_space<vmem>>, vector<1x4x16xf32>
    %154 = vector.shape_cast %153 : vector<1x4x16xf32> to vector<4x16xf32>
    %155 = vector.shape_cast %152 : vector<4x16xf32> to vector<1x4x16xf32>
    tpu.vector_store %arg8[%c0_63, %c0_64, %c176], %155 {strides = array<i32>} : memref<1x4x256xf32, #tpu.memory_space<vmem>>, vector<1x4x16xf32>,
    %156 = vector.extract_strided_slice %107 {offsets = [0, 216], sizes = [4, 16], strides = [1, 1]} : vector<4x286xf32> to vector<4x16xf32>
    %c0_65 = arith.constant 0 : index
    %c0_66 = arith.constant 0 : index
    %c192 = arith.constant 192 : index
    %157 = vector.load %arg8[%c0_65, %c0_66, %c192] : memref<1x4x256xf32, #tpu.memory_space<vmem>>, vector<1x4x16xf32>
    %158 = vector.shape_cast %157 : vector<1x4x16xf32> to vector<4x16xf32>
    %159 = vector.shape_cast %156 : vector<4x16xf32> to vector<1x4x16xf32>
    tpu.vector_store %arg8[%c0_65, %c0_66, %c192], %159 {strides = array<i32>} : memref<1x4x256xf32, #tpu.memory_space<vmem>>, vector<1x4x16xf32>,
    %160 = vector.extract_strided_slice %107 {offsets = [0, 234], sizes = [4, 16], strides = [1, 1]} : vector<4x286xf32> to vector<4x16xf32>
    %c0_67 = arith.constant 0 : index
    %c0_68 = arith.constant 0 : index
    %c208 = arith.constant 208 : index
    %161 = vector.load %arg8[%c0_67, %c0_68, %c208] : memref<1x4x256xf32, #tpu.memory_space<vmem>>, vector<1x4x16xf32>
    %162 = vector.shape_cast %161 : vector<1x4x16xf32> to vector<4x16xf32>
    %163 = vector.shape_cast %160 : vector<4x16xf32> to vector<1x4x16xf32>
    tpu.vector_store %arg8[%c0_67, %c0_68, %c208], %163 {strides = array<i32>} : memref<1x4x256xf32, #tpu.memory_space<vmem>>, vector<1x4x16xf32>,
    %164 = vector.extract_strided_slice %107 {offsets = [0, 252], sizes = [4, 16], strides = [1, 1]} : vector<4x286xf32> to vector<4x16xf32>
    %c0_69 = arith.constant 0 : index
    %c0_70 = arith.constant 0 : index
    %c224 = arith.constant 224 : index
    %165 = vector.load %arg8[%c0_69, %c0_70, %c224] : memref<1x4x256xf32, #tpu.memory_space<vmem>>, vector<1x4x16xf32>
    %166 = vector.shape_cast %165 : vector<1x4x16xf32> to vector<4x16xf32>
    %167 = vector.shape_cast %164 : vector<4x16xf32> to vector<1x4x16xf32>
    tpu.vector_store %arg8[%c0_69, %c0_70, %c224], %167 {strides = array<i32>} : memref<1x4x256xf32, #tpu.memory_space<vmem>>, vector<1x4x16xf32>,
    %168 = vector.extract_strided_slice %107 {offsets = [0, 270], sizes = [4, 16], strides = [1, 1]} : vector<4x286xf32> to vector<4x16xf32>
    %c0_71 = arith.constant 0 : index
    %c0_72 = arith.constant 0 : index
    %c240 = arith.constant 240 : index
    %169 = vector.load %arg8[%c0_71, %c0_72, %c240] : memref<1x4x256xf32, #tpu.memory_space<vmem>>, vector<1x4x16xf32>
    %170 = vector.shape_cast %169 : vector<1x4x16xf32> to vector<4x16xf32>
    %171 = vector.shape_cast %168 : vector<4x16xf32> to vector<1x4x16xf32>
    tpu.vector_store %arg8[%c0_71, %c0_72, %c240], %171 {strides = array<i32>} : memref<1x4x256xf32, #tpu.memory_space<vmem>>, vector<1x4x16xf32>,
    return
  }
  func.func @transform_0(%arg0: i32) -> (i32, i32, i32) {
    %c0_i32 = arith.constant 0 : i32
    %c0_i32_0 = arith.constant 0 : i32
    %c0_i32_1 = arith.constant 0 : i32
    return %arg0, %c0_i32, %c0_i32_0 : i32, i32, i32
  }
  func.func @transform_1(%arg0: i32) -> (i32, i32) {
    %c0_i32 = arith.constant 0 : i32
    %c0_i32_0 = arith.constant 0 : i32
    %c0_i32_1 = arith.constant 0 : i32
    return %c0_i32, %c0_i32_0 : i32, i32
  }
  func.func @transform_2(%arg0: i32) -> (i32, i32) {
    %c0_i32 = arith.constant 0 : i32
    %c0_i32_0 = arith.constant 0 : i32
    %c0_i32_1 = arith.constant 0 : i32
    return %c0_i32, %c0_i32_0 : i32, i32
  }
  func.func @transform_3(%arg0: i32) -> (i32, i32) {
    %c0_i32 = arith.constant 0 : i32
    %c0_i32_0 = arith.constant 0 : i32
    %c0_i32_1 = arith.constant 0 : i32
    return %c0_i32, %c0_i32_0 : i32, i32
  }
  func.func @transform_4(%arg0: i32) -> (i32, i32) {
    %c0_i32 = arith.constant 0 : i32
    %c0_i32_0 = arith.constant 0 : i32
    %c0_i32_1 = arith.constant 0 : i32
    return %c0_i32, %c0_i32_0 : i32, i32
  }
  func.func @transform_5(%arg0: i32) -> (i32, i32) {
    %c0_i32 = arith.constant 0 : i32
    %c0_i32_0 = arith.constant 0 : i32
    %c0_i32_1 = arith.constant 0 : i32
    return %c0_i32, %c0_i32_0 : i32, i32
  }
  func.func @transform_6(%arg0: i32) -> (i32, i32) {
    %c0_i32 = arith.constant 0 : i32
    %c0_i32_0 = arith.constant 0 : i32
    %c0_i32_1 = arith.constant 0 : i32
    return %c0_i32, %c0_i32_0 : i32, i32
  }
  func.func @transform_7(%arg0: i32) -> (i32, i32, i32) {
    %c0_i32 = arith.constant 0 : i32
    %c0_i32_0 = arith.constant 0 : i32
    %c0_i32_1 = arith.constant 0 : i32
    return %arg0, %c0_i32, %c0_i32_0 : i32, i32, i32
  }
}

</mosaic_0001>

<bundles_post_ra>
// kernel: tpu_custom_call.1
= control target key start
LH: loop header
LB: loop body
LE: loop exit
PB: predicated region body
PF: predicated region fallthrough
CT: control target
= control target key end

     0   :  { %12 = vsyncpa [#allocation4], 0  ;;  %s3623_s0 = inlined_call_operand.vmem [shape: f32[2,4,256], index: 0, kind: input, shape index: {}]   ;;  %s3624_s1 = inlined_call_operand.vmem [shape: f32[24,4], index: 1, kind: input, shape index: {}]   ;;  %s3625_s2 = inlined_call_operand.vmem [shape: f32[24,1], index: 2, kind: input, shape index: {}]   ;;  %s3626_s3 = inlined_call_operand.vmem [shape: f32[24,9], index: 3, kind: input, shape index: {}]   ;;  %s3627_s4 = inlined_call_operand.vmem [shape: f32[24,1], index: 4, kind: input, shape index: {}]   ;;  %s3628_s5 = inlined_call_operand.vmem [shape: f32[4,24], index: 5, kind: input, shape index: {}]   ;;  %s3629_s6 = inlined_call_operand.vmem [shape: f32[4,1], index: 6, kind: input, shape index: {}]   ;;  %s3630_s7 = inlined_call_operand.hbm [shape: f32[2,4,256], index: 7, kind: output, shape index: {}]  }
   0x1   :  { %14 = vsyncpa [#allocation4 + $0x1], 0  ;;  %s2708_s24 = smov 0   ;;  %s2710_s25 = smov 0  }
   0x2   :  { %s2712_s26 = smov 0   ;;  %s2714_s27 = smov 0  }
   0x3 LB: > { %s2729_s28 = sadd.s32 4294967295, %s2622_s27   ;;  %s2437_s29 = sadd.s32 4294967294, %s2622_s27   ;;  %s2622_s27 = sphi %s2714_s27, %s3636_s27   ;;  %s2618_s26 = sphi %s2712_s26, %s3635_s26   ;;  %s2614_s25 = sphi %s2710_s25, %s3634_s25   ;;  %s2610_s24 = sphi %s2708_s24, %s3633_s24  }
   0x4   : > { %s2733_s30 = sadd.s32 1, %s2622_s27   ;;  %s179_s8 = sadd.s32 1, %s2618_s26 }
   0x5   : > { %s176_s9 = ssub.s32 %s2622_s27, %s2733_s30  ;;  %p189_p0 = scmp.ne.s32.totalorder %s2618_s26, %s2614_s25 }
   0x6   : > { %p177_p1 = scmp.eq.s32.totalorder %s176_s9, 0  ;;  %p190_p2 = scmp.eq.s32.totalorder %s2729_s28, 1 }
   0x7   : > { %p195_p3 = scmp.ne.s32.totalorder %s2614_s25, %s2610_s24  ;;  %p196_p4 = scmp.eq.s32.totalorder %s2437_s29, 1 }
   0x8   : > { %s2744_s10 = scalar_select %p177_p1, %s2618_s26, %s179_s8  }
   0x9   : > { %p2746_p5 = por %p190_p2, %p189_p0  ;;  %p2750_p6 = por %p196_p4, %p195_p3 }
   0xa   : > { %p2440_p7 = scmp.ge.s32.totalorder %s2622_s27, 1  ;;  %p240_p8 = scmp.lt.s32.totalorder %s2622_s27, 3 }
   0xc   : > { %p241_p9 = pnand %p2440_p7, %p240_p8 }
   0xd   : > { %p272_p10 = scmp.lt.s32.totalorder (!%p241_p9), %s2729_s28, 1  ;;  %s2624_s18 = smov (!%p241_p9), 23  }
   0xe   : > { %244 = sbr.rel (%p241_p9) target bundleno = 1080 (0x438), region = 48  ;;  %s2625_s19 = smov (!%p241_p9), 19  }
   0xf   : > { %s2626_s20 = smov (!%p241_p9), 31   ;;  %s2627_s21 = smov (!%p241_p9), 25  }
  0x10   : > { %s2628_s22 = smov (!%p241_p9), 21   ;;  %s2629_s23 = smov (!%p241_p9), 27  }
  0x11   : > { %s2630_s29 = smov (!%p241_p9), 35   ;;  %s2631_s8 = smov (!%p241_p9), 29  }
  0x12   : > { %s2632_s9 = smov (!%p241_p9), 37   ;;  %s2635_s15 = smov (!%p241_p9), 41  }
  0x13   : > { %s273_s13 = scalar_select %p272_p10, %s2729_s28, 1  ;;  %v2640_v1 = vmov 0.0   ;;  %vm279_vm0 = vcmask 551936   ;;  %v2641_v2 = vmov 0   ;;  %v394_v3 = vld [vmem:[%s3625_s2] sm:$0xff]  ;;  %v2642_v6 = vmov 1  }
  0x14   : > { %s2636_s16 = smov 45   ;;  %278 = vst [vmem:[#allocation2] sm:$0xff] %v2640_v1  ;;  %2534 = vset.pattern.permute.xlu1 %v2641_v2  ;;  %2535 = vset.pattern.permute.xlu2 %v2641_v2  ;;  %v2769_v5 = vld [vmem:[%s3626_s3] sm:$0xff]  ;;  %v2776_v7 = vld [vmem:[%s3626_s3 + $0x8] sm:$0xff]  ;;  %vm285_vm1 = vcmask 281752   ;;  %v2782_v11 = vld [vmem:[%s3626_s3 + $0x10] sm:$0xff] }
  0x15   : > { %s2449_s14 = sshll.u32 %s273_s13, 3  ;;  %s2633_s13 = smov 39   ;;  %280 = vst.msk [vmem:[#allocation2 + $0x8] sm:$0xf] %vm279_vm0, %v2640_v1  ;;  %2537 = vset.pattern.permute.xlu0 %v2642_v6  ;;  %v2643_v12 = vmov 2   ;;  %vm290_vm2 = vcmask 429352  }
  0x16   : > { %s276_s17 = scalar_lea.vmem %s3623_s0, %s2449_s14  ;;  %s2634_s14 = smov 33   ;;  %vm295_vm3 = vcmask 576952   ;;  %vm300_vm4 = vcmask 724552   ;;  %vm305_vm5 = vcmask 872152   ;;  %vm318_vm6 = vcmask 1044472   ;;  %v395_v18 = vld [vmem:[%s3625_s2 + $0x8] sm:$0xff] }
  0x17   : > { %v277_v0 = vld [vmem:[%s276_s17] sm:$0xff]  ;;  %s2637_s17 = smov 43   ;;  %vm319_vm7 = vcmask 121860   ;;  %v2644_v17 = vmov 4   ;;  %vm315_vm8 = vcmask 252928   ;;  %vm310_vm9 = vcmask 1019752  }
  0x18   : > { %292 = vrot.lane.b32.xlu1 %v277_v0, %s2624_s18  ;;  %282 = vrot.lane.b32.xlu0 %v277_v0, %s2625_s19  ;;  %s2638_s18 = smov 47   ;;  %s2639_s19 = smov 49   ;;  %vm320_vm10 = vmor %vm319_vm7, %vm318_vm6  ;;  %vm330_vm11 = vcmask 285696   ;;  %vm325_vm12 = vcmask 265352   ;;  %v2645_v26 = vmov 7   ;;  %vm338_vm13 = vcmask 302080  }
  0x19   : > { %312 = vrot.lane.b32.xlu2 %v277_v0, %s2626_s20  ;;  %vm333_vm14 = vcmask 412952   ;;  %vm354_vm15 = vcmask 334848   ;;  %vm346_vm0 = vcmask 318464   ;;  %v391_v34 = vld [vmem:[%s3624_s1] sm:$0xff]  ;;  %v2646_v35 = vmov 5   ;;  %v392_v46 = vld [vmem:[%s3624_s1 + $0x8] sm:$0xff] }
  0x1a   : > { %vm374_vm6 = vcmask 105476   ;;  %v2647_v36 = vmov 8   ;;  %vm370_vm7 = vcmask 367616   ;;  %v2648_v47 = vmov 3   ;;  %v393_v53 = vld [vmem:[%s3624_s1 + $0x10] sm:$0xff]  ;;  %s2660_s20 = smov 118  }
  0x20   : > { %297 = vrot.lane.b32.xlu1 %v277_v0, %s2627_s21  ;;  %287 = vrot.lane.b32.xlu0 %v277_v0, %s2628_s22  ;;  %s2654_s22 = smov 109   ;;  %s2661_s21 = smov 106  }
  0x21   : > { %302 = vrot.lane.b32.xlu2 %v277_v0, %s2629_s23  ;;  %s2663_s23 = smov 100  }
  0x28   : > { %327 = vrot.lane.b32.xlu1 %v277_v0, %s2630_s29  ;;  %307 = vrot.lane.b32.xlu0 %v277_v0, %s2631_s8  ;;  %s2650_s29 = smov 126   ;;  %s2651_s8 = smov 127  }
  0x29   : > { %335 = vrot.lane.b32.xlu2 %v277_v0, %s2632_s9  ;;  %s2652_s9 = smov 110  }
  0x30   : > { %343 = vrot.lane.b32.xlu1 %v277_v0, %s2633_s13  ;;  %322 = vrot.lane.b32.xlu0 %v277_v0, %s2634_s14  ;;  %s2653_s13 = smov 92  }
  0x31   : > { %351 = vrot.lane.b32.xlu2 %v277_v0, %s2635_s15  ;;  %s2655_s15 = smov 122  }
  0x38   : > { %367 = vrot.lane.b32.xlu1 %v277_v0, %s2636_s16  ;;  %359 = vrot.lane.b32.xlu0 %v277_v0, %s2637_s17  ;;  %s2656_s16 = smov 124  }
  0x39   : > { %377 = vrot.lane.b32.xlu2 %v277_v0, %s2638_s18  ;;  %s2657_s18 = smov 120  }
  0x40   : > { %383 = vrot.lane.b32.xlu0 %v277_v0, %s2639_s19  ;;  %407 = vperm.xlu1 %2534, %v394_v3   ;;  %s2659_s19 = smov 108  }
  0x41   : > { %412 = vperm.xlu2 %2535, %v395_v18  }
  0x48   : > { %1089 = vperm.xlu1 %2534, %v2769_v5   ;;  %1116 = vperm.xlu0 %2537, %v2776_v7  }
  0x49   : > { %1094 = vperm.xlu2 %2535, %v2776_v7  }
  0x50   : > { %1099 = vperm.xlu1 %2534, %v2782_v11   ;;  %2539 = vset.pattern.permute.xlu0 %v2643_v12 }
  0x51   : > { %1185 = vperm.xlu0 %2539, %v2769_v5   ;;  %2536 = vset.pattern.permute.xlu2 %v2642_v6 }
  0x52   : > { %1112 = vperm.xlu2 %2536, %v2769_v5  }
  0x58   : > { %2538 = vset.pattern.permute.xlu1 %v2642_v6 }
  0x59   : > { %1120 = vperm.xlu1 %2538, %v2782_v11   ;;  %2543 = vset.pattern.permute.xlu0 %v2644_v17 }
  0x5a   : > { %1283 = vperm.xlu0 %2543, %v2776_v7   ;;  %2541 = vset.pattern.permute.xlu2 %v2643_v12 }
  0x5b   : > { %1193 = vperm.xlu2 %2541, %v2782_v11  }
  0x61   : > { %2540 = vset.pattern.permute.xlu1 %v2643_v12 }
  0x62   : > { %1189 = vperm.xlu1 %2540, %v2776_v7   ;;  %2548 = vset.pattern.permute.xlu0 %v2645_v26 }
  0x63   : > { %1448 = vperm.xlu0 %2548, %v2776_v7   ;;  %2542 = vset.pattern.permute.xlu2 %v2644_v17 }
  0x64   : > { %1287 = vperm.xlu2 %2542, %v2782_v11  }
  0x6a   : > { %2544 = vset.pattern.permute.xlu1 %v2646_v35 }
  0x6b   : > { %1359 = vperm.xlu1 %2544, %v2782_v11   ;;  %2552 = vset.pattern.permute.xlu0 %v2647_v36 }
  0x6c   : > { %1516 = vperm.xlu0 %2552, %v2769_v5   ;;  %2545 = vset.pattern.permute.xlu2 %v2645_v26 }
  0x6d   : > { %1452 = vperm.xlu2 %2545, %v2782_v11  }
  0x73   : > { %v313_v4 = vpop.permute.xlu2 %312  ;;  %2546 = vset.pattern.permute.xlu1 %v2644_v17 }
  0x74   : > { %v314_v16 = vrot.slane %v313_v4, 4  ;;  %1279 = vperm.xlu1 %2546, %v2769_v5   ;;  %2554 = vset.pattern.permute.xlu0 %v2648_v47 }
  0x75   : > { %1262 = vperm.xlu0 %2554, %v2776_v7   ;;  %2547 = vset.pattern.permute.xlu2 %v2646_v35 }
  0x76   : > { %v316_v21 = vsel %vm315_vm8, %v314_v16, %v313_v4  ;;  %vm362_vm8 = vcmask 351232   ;;  %1355 = vperm.xlu2 %2547, %v2776_v7  }
  0x7b   : > { %v303_v8 = vpop.permute.xlu2 %302 }
  0x7c   : > { %2549 = vset.pattern.permute.xlu1 %v2647_v36 }
  0x7d   : > { %1524 = vperm.xlu1 %2549, %v2782_v11   ;;  %1258 = vperm.xlu0 %2554, %v2769_v5  }
  0x7e   : > { %1351 = vperm.xlu2 %2547, %v2769_v5  }
  0x83   : > { %v336_v15 = vpop.permute.xlu2 %335 }
  0x84   : > { %v337_v24 = vrot.slane %v336_v15, 4 }
  0x85   : > { %2550 = vset.pattern.permute.xlu1 %v2645_v26  ;;  %2556 = vset.pattern.permute.xlu0 %v2641_v2 }
  0x86   : > { %v339_v31 = vsel %vm338_vm13, %v336_v15, %v337_v24  ;;  %1444 = vperm.xlu1 %2550, %v2769_v5   ;;  %vm387_vm13 = vcmask 396552   ;;  %v2649_v24 = vmov 6   ;;  %2551 = vset.pattern.permute.xlu2 %v2647_v36 }
  0x87   : > { %1520 = vperm.xlu2 %2551, %v2776_v7  }
  0x8a   : > { %v293_v9 = vpop.permute.xlu1 %292  ;;  %v283_v10 = vpop.permute.xlu0 %282 }
  0x8b   : > { %286 = vst.msk [vmem:[#allocation2] sm:$0xf] %vm285_vm1, %v283_v10  ;;  %v352_v22 = vpop.permute.xlu2 %351  ;;  %vm341_vm1 = vcmask 560552  }
  0x8c   : > { %v353_v25 = vrot.slane %v352_v22, 4 }
  0x8e   : > { %v355_v32 = vsel %vm354_vm15, %v352_v22, %v353_v25  ;;  %2553 = vset.pattern.permute.xlu1 %v2648_v47  ;;  %vm1232_vm15 = vcmask 1031168  }
  0x8f   : > { %1266 = vperm.xlu1 %2553, %v2782_v11   ;;  %2557 = vset.pattern.permute.xlu2 %v2649_v24 }
  0x90   : > { %1423 = vperm.xlu2 %2557, %v2769_v5  }
  0x92   : > { %v298_v13 = vpop.permute.xlu1 %297  ;;  %v288_v14 = vpop.permute.xlu0 %287 }
  0x93   : > { %291 = vst.msk [vmem:[#allocation2] sm:$0xf] %vm290_vm2, %v288_v14  ;;  %vm349_vm2 = vcmask 708152  }
  0x94   : > { %296 = vst.msk [vmem:[#allocation2] sm:$0xf] %vm295_vm3, %v293_v9  ;;  %vm357_vm3 = vcmask 855752  }
  0x95   : > { %301 = vst.msk [vmem:[#allocation2] sm:$0xf] %vm300_vm4, %v298_v13  ;;  %vm428_vm4 = vcmask 31744   ;;  %v396_v13 = vld [vmem:[%s3625_s2 + $0x10] sm:$0xff] }
  0x96   : > { %306 = vst.msk [vmem:[#allocation2] sm:$0xf] %vm305_vm5, %v303_v8  ;;  %vm373_vm5 = vcmask 1044456   ;;  %v430_v39 = vsel %vm428_vm4, %v391_v34, 0  ;;  %v433_v48 = vsel %vm428_vm4, %v392_v46, 0  ;;  %v436_v55 = vsel %vm428_vm4, %v393_v53, 0  ;;  %417 = vperm.xlu0 %2556, %v396_v13  }
  0x97   : > { %v2809_v44 = vand.u32 4294901760, %v430_v39  ;;  %v2827_v51 = vand.u32 4294901760, %v433_v48  ;;  %v2850_v62 = vand.u32 4294901760, %v436_v55  ;;  %2555 = vset.pattern.permute.xlu1 %v2649_v24  ;;  %vm2279_vm4 = vcmask 125952  }
  0x98   : > { %1431 = vperm.xlu1 %2555, %v2782_v11   ;;  %2559 = vset.pattern.permute.xlu2 %v2641_v2 }
  0x99   : > { %v2813_v45 = vsub.f32 %v430_v39, %v2809_v44  ;;  %v2838_v54 = vsub.f32 %v433_v48, %v2827_v51  ;;  %v2857_v6 = vsub.f32 %v436_v55, %v2850_v62 }
  0x9a   : > { %v328_v19 = vpop.permute.xlu1 %327  ;;  %v308_v20 = vpop.permute.xlu0 %307 }
  0x9b   : > { %311 = vst.msk [vmem:[#allocation2] sm:$0xf] %vm310_vm9, %v308_v20  ;;  %v329_v23 = vrot.slane %v328_v19, 4  ;;  %vm365_vm9 = vcmask 1003352   ;;  %v2825_v49 = vand.u32 4294901760, %v2813_v45  ;;  %v2848_v61 = vand.u32 4294901760, %v2838_v54 }
  0x9c   : > { %321 = vst.msk [vmem:[#allocation2] sm:$0xff] %vm320_vm10, %v316_v21  ;;  %vm375_vm10 = vmor %vm374_vm6, %vm373_vm5  ;;  %v2868_v15 = vand.u32 4294901760, %v2857_v6  ;;  %vm2285_vm5 = vcmask 257152   ;;  %vm2290_vm6 = vcmask 388352  }
  0x9d   : > { %v331_v29 = vsel %vm330_vm11, %v328_v19, %v329_v23  ;;  %v465_v52 = vsub.f32 %v2813_v45, %v2825_v49  ;;  %vm438_vm11 = vcmask 1043456   ;;  %v473_v4 = vsub.f32 %v2838_v54, %v2848_v61  ;;  %v378_v19 = vpop.permute.xlu2 %377 }
  0x9e   : > { %v481_v18 = vsub.f32 %v2857_v6, %v2868_v15  ;;  %v379_v21 = vrot.slane %v378_v19, 4 }
  0x9f   : > { %v2843_v56 = vand.u32 4294901760, %v465_v52  ;;  %v2865_v14 = vand.u32 4294901760, %v473_v4 }
  0xa0   : > { %v2880_v20 = vand.u32 4294901760, %v481_v18  ;;  %1427 = vperm.xlu1 %2555, %v2776_v7  }
  0xa2   : > { %v344_v27 = vpop.permute.xlu1 %343  ;;  %v323_v28 = vpop.permute.xlu0 %322 }
  0xa3   : > { %v345_v30 = vrot.slane %v344_v27, 4  ;;  %326 = vst.msk [vmem:[#allocation2 + $0x4] sm:$0xf] %vm325_vm12, %v323_v28  ;;  %vm381_vm12 = vcmask 248952  }
  0xa4   : > { %334 = vst.msk [vmem:[#allocation2 + $0x4] sm:$0xf] %vm333_vm14, %v331_v29  ;;  %vm1159_vm14 = vcmask 1039360  }
  0xa5   : > { %v347_v33 = vsel %vm346_vm0, %v344_v27, %v345_v30  ;;  %342 = vst.msk [vmem:[#allocation2 + $0x4] sm:$0xf] %vm341_vm1, %v339_v31  ;;  %v2936_v5 = vpop.permute.xlu2 %412  ;;  %vm1614_vm0 = vcmask 900096   ;;  %vm1666_vm1 = vcmask 752640  }
  0xa6   : > { %350 = vst.msk [vmem:[#allocation2 + $0x4] sm:$0xf] %vm349_vm2, %v347_v33  ;;  %vm1738_vm2 = vcmask 195584  }
  0xa7   : > { %358 = vst.msk [vmem:[#allocation2 + $0x4] sm:$0xf] %vm357_vm3, %v355_v32  ;;  %vm2270_vm3 = vcmask 891904  }
  0xa8   : > { %2558 = vset.pattern.permute.xlu1 %v2641_v2 }
  0xaa   : > { %v368_v37 = vpop.permute.xlu1 %367  ;;  %v360_v38 = vpop.permute.xlu0 %359 }
  0xab   : > { %v369_v40 = vrot.slane %v368_v37, 4  ;;  %v361_v41 = vrot.slane %v360_v38, 4 }
  0xad   : > { %v371_v42 = vsel %vm370_vm7, %v368_v37, %v369_v40  ;;  %v363_v43 = vsel %vm362_vm8, %v360_v38, %v361_v41  ;;  %v2944_v33 = vpop.permute.xlu2 %1094  ;;  %vm2295_vm7 = vcmask 519552   ;;  %vm2300_vm8 = vcmask 650752  }
  0xae   : > { %366 = vst.msk [vmem:[#allocation2 + $0x4] sm:$0xf] %vm365_vm9, %v363_v43  ;;  %vm2305_vm9 = vcmask 781952  }
  0xaf   : > { %376 = vst.msk [vmem:[#allocation2 + $0x4] sm:$0xff] %vm375_vm10, %v371_v42  ;;  %vm2310_vm10 = vcmask 913152  }
  0xb0   : > { %382 = vst.msk [vmem:[#allocation2 + $0x8] sm:$0xf] %vm381_vm12, %v379_v21  ;;  %vm2321_vm12 = vcmask 1044352  }
  0xb2   : > { %v384_v22 = vpop.permute.xlu0 %383  ;;  %v2932_v2 = vpop.permute.xlu1 %407 }
  0xb3   : > { %v385_v23 = vrot.slane %v384_v22, 4 }
  0xb5   : > { %388 = vst.msk [vmem:[#allocation2 + $0x8] sm:$0xf] %vm387_vm13, %v385_v23  ;;  %v2952_v36 = vpop.permute.xlu2 %1112  ;;  %vm2353_vm13 = vcmask 818176  }
  0xb6   : > { %v389_v50 = vld [vmem:[#allocation2] sm:$0xff] }
  0xb7   : > { %422 = vst [vmem:[#allocation1] ss:$2 sm:$0xff] %v389_v50 }
  0xba   : > { %v2940_v31 = vpop.permute.xlu1 %1089  ;;  %v2942_v32 = vpop.permute.xlu0 %1116 }
  0xbc   : > { %v390_v25 = vld [vmem:[#allocation2 + $0x8] sm:$0xf] }
  0xbd   : > { %424 = vst [vmem:[#allocation1 + $0x10] ss:$2 sm:$0xff] %v390_v25  ;;  %v2961_v39 = vpop.permute.xlu2 %1193 }
  0xbe   : > { %v425_v57 = vld.sshfl [vmem:[#allocation1] sm:$0xff pattern:$0x75316420]  ;;  %v426_v58 = vld.sshfl [vmem:[#allocation1 + $0x8] sm:$0xff pattern:$0x75316420] }
  0xbf   : > { %v439_v59 = vsel %vm438_vm11, %v425_v57, 0  ;;  %v441_v60 = vsel %vm438_vm11, %v426_v58, 0  ;;  %2258 = vst [vmem:[#allocation1] ss:$2 sm:$0xff] %v389_v50 }
  0xc0   : > { %v460_v63 = vand.u32 4294901760, %v439_v59  ;;  %v668_v0 = vand.u32 4294901760, %v441_v60 }
  0xc2   : > { %461 = vmatpush.msra.mxu0 %v460_v63  ;;  %571 = vmatpush.msra.mxu3 %v460_v63  ;;  %v503_v1 = vsub.f32 %v439_v59, %v460_v63  ;;  %v711_v3 = vsub.f32 %v441_v60, %v668_v0  ;;  %v2948_v34 = vpop.permute.xlu1 %1099 }
  0xc3   : > { %467 = vmatmul.f32.vlgmr.msra.gmra.mxu0 %v2843_v56  ;;  %575 = vmatmul.f32.vlgmr.msra.gmra.mxu3 %v2825_v49  ;;  %v2950_v35 = vpop.permute.xlu0 %1185 }
  0xc4   : > { %538 = vmatpush.msra.mxu2 %v503_v1  ;;  %v504_v8 = vand.u32 4294901760, %v503_v1  ;;  %v712_v9 = vand.u32 4294901760, %v711_v3  ;;  %v427_v11 = vld.sshfl [vmem:[#allocation1 + $0x10] sm:$0xff pattern:$0x75316420] }
  0xc5   : > { %541 = vmatmul.f32.vlgmr.msra.gmra.mxu2 %v2813_v45  ;;  %v443_v26 = vsel %vm438_vm11, %v427_v11, 0  ;;  %2260 = vst [vmem:[#allocation1 + $0x10] ss:$2 sm:$0xff] %v390_v25  ;;  %v2967_v43 = vpop.permute.xlu2 %1287 }
  0xc6   : > { %669 = vmatpush.msrb.mxu2 %v668_v0  ;;  %609 = vmatpush.msrb.mxu0 %v504_v8  ;;  %v505_v10 = vsub.f32 %v503_v1, %v504_v8  ;;  %v713_v12 = vsub.f32 %v711_v3, %v712_v9  ;;  %v876_v27 = vand.u32 4294901760, %v443_v26 }
  0xc8   : > { %817 = vmatpush.msra.mxu2 %v712_v9  ;;  %746 = vmatpush.msra.mxu0 %v711_v3  ;;  %v506_v16 = vand.u32 4294901760, %v505_v10  ;;  %v714_v17 = vand.u32 4294901760, %v713_v12  ;;  %v919_v28 = vsub.f32 %v443_v26, %v876_v27 }
  0xca   : > { %507 = vmatpush.msra.mxu1 %v506_v16  ;;  %715 = vmatpush.msrb.mxu3 %v714_v17  ;;  %v920_v7 = vand.u32 4294901760, %v919_v28 }
  0xcb   : > { %475 = vmatmul.f32.gmra.mxu0 %v2865_v14  ;;  %509 = vmatmul.f32.vlgmr.msra.gmra.mxu1 %v2809_v44  ;;  %v2956_v37 = vpop.permute.xlu1 %1120 }
  0xcc   : > { %639 = vmatpush.msrb.mxu1 %v460_v63  ;;  %847 = vmatpush.msra.mxu3 %v668_v0  ;;  %v921_v29 = vsub.f32 %v919_v28, %v920_v7  ;;  %v2958_v38 = vpop.permute.xlu0 %1283 }
  0xcd   : > { %546 = vmatmul.f32.gmra.mxu2 %v2838_v54  ;;  %581 = vmatmul.f32.gmra.mxu3 %v2848_v61  ;;  %v2974_v55 = vpop.permute.xlu2 %1452 }
  0xce   : > { %779 = vmatpush.msra.mxu1 %v668_v0  ;;  %v922_v30 = vand.u32 4294901760, %v921_v29 }
  0xd3   : > { %483 = vmatmul.f32.gmra.mxu0 %v2880_v20  ;;  %513 = vmatmul.f32.gmra.mxu1 %v2827_v51 }
  0xd4   : > { %v2963_v41 = vpop.permute.xlu1 %1189 }
  0xd5   : > { %551 = vmatmul.f32.gmra.mxu2 %v2857_v6  ;;  %587 = vmatmul.f32.gmra.mxu3 %v2868_v15  ;;  %v2965_v42 = vpop.permute.xlu0 %1448  ;;  %v2983_v1 = vpop.permute.xlu2 %1355 }
  0xdb   : > { %517 = vmatmul.f32.gmra.mxu1 %v2850_v62  ;;  %611 = vmatmul.f32.vlgmr.msrb.gmra.mxu0 %v2809_v44 }
  0xdc   : > { %877 = vmatpush.msrb.mxu0 %v876_v27 }
  0xdd   : > { %675 = vmatmul.f32.vlgmr.msrb.gmra.mxu2 %v2843_v56  ;;  %717 = vmatmul.f32.vlgmr.msrb.gmra.mxu3 %v2809_v44  ;;  %v2969_v48 = vpop.permute.xlu1 %1359  ;;  %v2991_v19 = vpop.permute.xlu2 %1351 }
  0xde   : > { %954 = vmatpush.msrb.mxu2 %v919_v28  ;;  %987 = vmatpush.msrb.mxu3 %v876_v27 }
  0xe3   : > { %615 = vmatmul.f32.gmra.mxu0 %v2827_v51  ;;  %641 = vmatmul.f32.vlgmr.msrb.gmra.mxu1 %v2809_v44 }
  0xe4   : > { %923 = vmatpush.msrb.mxu1 %v922_v30 }
  0xe5   : > { %683 = vmatmul.f32.gmra.mxu2 %v2865_v14  ;;  %721 = vmatmul.f32.gmra.mxu3 %v2827_v51 }
  0xeb   : > { %619 = vmatmul.f32.gmra.mxu0 %v2850_v62  ;;  %645 = vmatmul.f32.gmra.mxu1 %v2827_v51 }
  0xed   : > { %691 = vmatmul.f32.gmra.mxu2 %v2880_v20  ;;  %725 = vmatmul.f32.gmra.mxu3 %v2850_v62 }
  0xf3   : > { %649 = vmatmul.f32.gmra.mxu1 %v2850_v62  ;;  %749 = vmatmul.f32.vlgmr.msra.gmra.mxu0 %v2813_v45 }
  0xf4   : > { %1025 = vmatpush.msra.mxu0 %v920_v7 }
  0xf5   : > { %819 = vmatmul.f32.vlgmr.msra.gmra.mxu2 %v2809_v44  ;;  %849 = vmatmul.f32.vlgmr.msra.gmra.mxu3 %v2809_v44 }
  0xfb   : > { %754 = vmatmul.f32.gmra.mxu0 %v2838_v54  ;;  %783 = vmatmul.f32.vlgmr.msra.gmra.mxu1 %v2825_v49 }
  0xfc   : > { %1055 = vmatpush.msra.mxu1 %v876_v27 }
  0xfd   : > { %823 = vmatmul.f32.gmra.mxu2 %v2827_v51  ;;  %853 = vmatmul.f32.gmra.mxu3 %v2827_v51 }
 0x103   : > { %759 = vmatmul.f32.gmra.mxu0 %v2857_v6  ;;  %789 = vmatmul.f32.gmra.mxu1 %v2848_v61 }
 0x105   : > { %827 = vmatmul.f32.gmra.mxu2 %v2850_v62  ;;  %857 = vmatmul.f32.gmra.mxu3 %v2850_v62 }
 0x10b   : > { %795 = vmatmul.f32.gmra.mxu1 %v2868_v15  ;;  %883 = vmatmul.f32.vlgmr.msrb.gmra.mxu0 %v2843_v56 }
 0x10d   : > { %957 = vmatmul.f32.vlgmr.msrb.gmra.mxu2 %v2813_v45  ;;  %991 = vmatmul.f32.vlgmr.msrb.gmra.mxu3 %v2825_v49  ;;  %v2971_v49 = vpop.permute.xlu0 %1516 }
 0x113   : > { %891 = vmatmul.f32.gmra.mxu0 %v2865_v14  ;;  %925 = vmatmul.f32.vlgmr.msrb.gmra.mxu1 %v2809_v44 }
 0x115   : > { %962 = vmatmul.f32.gmra.mxu2 %v2838_v54  ;;  %997 = vmatmul.f32.gmra.mxu3 %v2848_v61  ;;  %v2980_v63 = vpop.permute.xlu0 %1262 }
 0x11b   : > { %899 = vmatmul.f32.gmra.mxu0 %v2880_v20  ;;  %929 = vmatmul.f32.gmra.mxu1 %v2827_v51 }
 0x11d   : > { %967 = vmatmul.f32.gmra.mxu2 %v2857_v6  ;;  %1003 = vmatmul.f32.gmra.mxu3 %v2868_v15  ;;  %v2987_v17 = vpop.permute.xlu0 %1258 }
 0x123   : > { %933 = vmatmul.f32.gmra.mxu1 %v2850_v62  ;;  %1027 = vmatmul.f32.vlgmr.msra.gmra.mxu0 %v2809_v44 }
 0x125   : > { %v3004_v29 = vpop.permute.xlu0 %417 }
 0x12b   : > { %1031 = vmatmul.f32.gmra.mxu0 %v2827_v51  ;;  %1057 = vmatmul.f32.vlgmr.msra.gmra.mxu1 %v2809_v44 }
 0x133   : > { %1035 = vmatmul.f32.gmra.mxu0 %v2850_v62  ;;  %1061 = vmatmul.f32.gmra.mxu1 %v2827_v51 }
 0x13b   : > { %1065 = vmatmul.f32.gmra.mxu1 %v2850_v62  ;;  %v2978_v62 = vpop.permute.xlu1 %1279 }
 0x140   : > { %v468_v40 = vpop.f32.mrf.mxu0 }
 0x141   : > { %v469_v52 = vadd.f32 %v468_v40, %v2932_v2 }
 0x143   : > { %v2985_v16 = vpop.permute.xlu1 %1524 }
 0x146   : > { %v576_v44 = vpop.f32.mrf.mxu3 }
 0x148   : > { %v476_v45 = vpop.f32.mrf.mxu0  ;;  %v510_v46 = vpop.f32.mrf.mxu1 }
 0x149   : > { %v542_v47 = vpop.f32.mrf.mxu2  ;;  %v511_v56 = vadd.f32 %v510_v46, %v469_v52  ;;  %v477_v0 = vadd.f32 %v476_v45, %v2936_v5 }
 0x14b   : > { %v543_v59 = vadd.f32 %v542_v47, %v511_v56  ;;  %v3002_v7 = vpop.permute.xlu1 %1444 }
 0x14d   : > { %v577_v3 = vadd.f32 %v576_v44, %v543_v59 }
 0x150   : > { %v484_v50 = vpop.f32.mrf.mxu0  ;;  %v514_v51 = vpop.f32.mrf.mxu1 }
 0x151   : > { %v547_v53 = vpop.f32.mrf.mxu2  ;;  %v582_v54 = vpop.f32.mrf.mxu3  ;;  %v515_v4 = vadd.f32 %v514_v51, %v477_v0 }
 0x153   : > { %v548_v14 = vadd.f32 %v547_v53, %v515_v4  ;;  %v485_v53 = vadd.f32 %v484_v50, %v3004_v29 }
 0x155   : > { %v583_v20 = vadd.f32 %v582_v54, %v548_v14 }
 0x158   : > { %v518_v57 = vpop.f32.mrf.mxu1  ;;  %v612_v58 = vpop.f32.mrf.mxu0 }
 0x159   : > { %v552_v60 = vpop.f32.mrf.mxu2  ;;  %v2976_v61 = vpop.f32.mrf.mxu3  ;;  %v613_v6 = vadd.f32 %v612_v58, %v577_v3  ;;  %v519_v58 = vadd.f32 %v518_v57, %v485_v53 }
 0x160   : > { %v616_v8 = vpop.f32.mrf.mxu0  ;;  %v642_v9 = vpop.f32.mrf.mxu1 }
 0x161   : > { %v643_v10 = vadd.f32 %v642_v9, %v613_v6  ;;  %v676_v12 = vpop.f32.mrf.mxu2  ;;  %v718_v13 = vpop.f32.mrf.mxu3  ;;  %v617_v11 = vadd.f32 %v616_v8, %v583_v20 }
 0x162   : > { %v677_v47 = vadd.f32 %v676_v12, %v2932_v2 }
 0x163   : > { %v1069_v15 = vmax.f32 %v643_v10, 0.0  ;;  %v553_v10 = vadd.f32 %v552_v60, %v519_v58 }
 0x164   : > { %v719_v56 = vadd.f32 %v718_v13, %v677_v47 }
 0x165   : > { %v2989_v18 = vmin.f32 %v1069_v15, 6.0  ;;  %v589_v57 = vadd.f32 %v2976_v61, %v553_v10 }
 0x167   : > { %v1362_v21 = vmul.f32 %v2991_v19, %v2989_v18  ;;  %v1123_v22 = vmul.f32 %v2952_v36, %v2989_v18  ;;  %v1196_v23 = vmul.f32 %v2950_v35, %v2989_v18  ;;  %v1455_v40 = vmul.f32 %v3002_v7, %v2989_v18 }
 0x168   : > { %v620_v24 = vpop.f32.mrf.mxu0  ;;  %v646_v25 = vpop.f32.mrf.mxu1  ;;  %v1290_v44 = vmul.f32 %v2978_v62, %v2989_v18  ;;  %v1527_v3 = vmul.f32 %v2971_v49, %v2989_v18 }
 0x169   : > { %v684_v26 = vpop.f32.mrf.mxu2  ;;  %1380 = vrot.lane.b32.xlu0 %v1362_v21, %s2650_s29  ;;  %1141 = vrot.lane.b32.xlu2 %v1123_v22, %s2651_s8  ;;  %v722_v27 = vpop.f32.mrf.mxu3  ;;  %v647_v28 = vadd.f32 %v646_v25, %v617_v11 }
 0x16a   : > { %1214 = vrot.lane.b32.xlu1 %v1196_v23, %s2650_s29  ;;  %v621_v23 = vadd.f32 %v620_v24, %v589_v57  ;;  %v3038_v11 = vpop.permute.xlu2 %1520 }
 0x16b   : > { %v1072_v30 = vmax.f32 %v647_v28, 0.0  ;;  %v685_v28 = vadd.f32 %v684_v26, %v2936_v5 }
 0x16d   : > { %v3018_v54 = vmin.f32 %v1072_v30, 6.0  ;;  %v723_v47 = vadd.f32 %v722_v27, %v685_v28 }
 0x16f   : > { %v1293_v0 = vmul.f32 %v2958_v38, %v3018_v54  ;;  %v1365_v15 = vmul.f32 %v2983_v1, %v3018_v54  ;;  %v1126_v20 = vmul.f32 %v2942_v32, %v3018_v54  ;;  %v1458_v24 = vmul.f32 %v2965_v42, %v3018_v54 }
 0x170   : > { %v650_v45 = vpop.f32.mrf.mxu1  ;;  %v750_v46 = vpop.f32.mrf.mxu0 }
 0x171   : > { %1473 = vrot.lane.b32.xlu0 %v1455_v40, %s2651_s8  ;;  %1308 = vrot.lane.b32.xlu2 %v1290_v44, %s2651_s8  ;;  %v3013_v51 = vpop.f32.mrf.mxu2  ;;  %v3015_v52 = vpop.f32.mrf.mxu3  ;;  %v751_v59 = vadd.f32 %v750_v46, %v719_v56  ;;  %v651_v60 = vadd.f32 %v650_v45, %v621_v23  ;;  %v1530_v40 = vmul.f32 %v3038_v11, %v3018_v54 }
 0x173   : > { %v1075_v30 = vmax.f32 %v651_v60, 0.0 }
 0x175   : > { %v3047_v53 = vmin.f32 %v1075_v30, 6.0 }
 0x177   : > { %v1533_v10 = vmul.f32 %v2985_v16, %v3047_v53  ;;  %v1461_v30 = vmul.f32 %v2974_v55, %v3047_v53 }
 0x178   : > { %v755_v4 = vpop.f32.mrf.mxu0  ;;  %v784_v6 = vpop.f32.mrf.mxu1 }
 0x179   : > { %v785_v8 = vadd.f32 %v784_v6, %v751_v59  ;;  %1314 = vrot.lane.b32.xlu2 %v1293_v0, %s2651_s8  ;;  %1545 = vrot.lane.b32.xlu0 %v1527_v3, %s2650_s29  ;;  %v820_v9 = vpop.f32.mrf.mxu2  ;;  %v850_v50 = vpop.f32.mrf.mxu3  ;;  %v756_v56 = vadd.f32 %v755_v4, %v723_v47  ;;  %v1296_v0 = vmul.f32 %v2967_v43, %v3047_v53 }
 0x17a   : > { %v1129_v3 = vmul.f32 %v2956_v37, %v3047_v53 }
 0x17b   : > { %v821_v12 = vadd.f32 %v820_v9, %v785_v8 }
 0x17d   : > { %v851_v13 = vadd.f32 %v850_v50, %v821_v12  ;;  %v1368_v12 = vmul.f32 %v2969_v48, %v3047_v53 }
 0x17f   : > { %v1070_v14 = vmax.f32 %v851_v13, 0.0 }
 0x180   : > { %v760_v21 = vpop.f32.mrf.mxu0  ;;  %v790_v22 = vpop.f32.mrf.mxu1 }
 0x181   : > { %v3031_v25 = vmin.f32 %v1070_v14, 6.0  ;;  %1386 = vrot.lane.b32.xlu2 %v1365_v15, %s2650_s29  ;;  %1147 = vrot.lane.b32.xlu0 %v1126_v20, %s2651_s8  ;;  %v824_v45 = vpop.f32.mrf.mxu2  ;;  %v854_v58 = vpop.f32.mrf.mxu3  ;;  %v791_v59 = vadd.f32 %v790_v22, %v756_v56 }
 0x183   : > { %v1124_v61 = vmul.f32 %v2952_v36, %v3031_v25  ;;  %v1363_v26 = vmul.f32 %v2991_v19, %v3031_v25  ;;  %v825_v27 = vadd.f32 %v824_v45, %v791_v59  ;;  %v1456_v4 = vmul.f32 %v3002_v7, %v3031_v25 }
 0x184   : > { %v1528_v22 = vmul.f32 %v2971_v49, %v3031_v25  ;;  %v1291_v59 = vmul.f32 %v2978_v62, %v3031_v25 }
 0x185   : > { %1143 = vrot.lane.b32.xlu1 %v1124_v61, %s2651_s8  ;;  %v855_v50 = vadd.f32 %v854_v58, %v825_v27  ;;  %v693_v61 = vadd.f32 %v3013_v51, %v3004_v29 }
 0x187   : > { %v1073_v15 = vmax.f32 %v855_v50, 0.0 }
 0x188   : > { %v796_v44 = vpop.f32.mrf.mxu1  ;;  %v884_v46 = vpop.f32.mrf.mxu0 }
 0x189   : > { %1479 = vrot.lane.b32.xlu2 %v1458_v24, %s2651_s8  ;;  %1551 = vrot.lane.b32.xlu0 %v1530_v40, %s2650_s29  ;;  %v828_v9 = vpop.f32.mrf.mxu2  ;;  %v858_v13 = vpop.f32.mrf.mxu3  ;;  %v885_v20 = vadd.f32 %v884_v46, %v2932_v2  ;;  %v3075_v28 = vmin.f32 %v1073_v15, 6.0  ;;  %v727_v46 = vadd.f32 %v3015_v52, %v693_v61 }
 0x18b   : > { %v1127_v45 = vmul.f32 %v2942_v32, %v3075_v28  ;;  %v1294_v52 = vmul.f32 %v2958_v38, %v3075_v28  ;;  %v1366_v50 = vmul.f32 %v2983_v1, %v3075_v28 }
 0x18d   : > { %1382 = vrot.lane.b32.xlu1 %v1363_v26, %s2650_s29  ;;  %v761_v26 = vadd.f32 %v760_v21, %v727_v46 }
 0x18f   : > { %v797_v51 = vadd.f32 %v796_v44, %v761_v26 }
 0x190   : > { %v892_v6 = vpop.f32.mrf.mxu0  ;;  %v926_v8 = vpop.f32.mrf.mxu1 }
 0x191   : > { %1320 = vrot.lane.b32.xlu2 %v1296_v0, %s2651_s8  ;;  %1153 = vrot.lane.b32.xlu0 %v1129_v3, %s2651_s8  ;;  %v927_v23 = vadd.f32 %v926_v8, %v885_v20  ;;  %v958_v60 = vpop.f32.mrf.mxu2  ;;  %v992_v2 = vpop.f32.mrf.mxu3  ;;  %v829_v8 = vadd.f32 %v828_v9, %v797_v51  ;;  %v1459_v20 = vmul.f32 %v2965_v42, %v3075_v28 }
 0x193   : > { %v959_v40 = vadd.f32 %v958_v60, %v927_v23  ;;  %v859_v21 = vadd.f32 %v858_v13, %v829_v8 }
 0x195   : > { %1475 = vrot.lane.b32.xlu1 %v1456_v4, %s2651_s8  ;;  %v993_v56 = vadd.f32 %v992_v2, %v959_v40  ;;  %v1076_v9 = vmax.f32 %v859_v21, 0.0 }
 0x197   : > { %v3104_v15 = vmin.f32 %v1076_v9, 6.0 }
 0x198   : > { %v930_v57 = vpop.f32.mrf.mxu1  ;;  %v3067_v14 = vpop.f32.mrf.mxu0 }
 0x199   : > { %1557 = vrot.lane.b32.xlu2 %v1533_v10, %s2650_s29  ;;  %1392 = vrot.lane.b32.xlu0 %v1368_v12, %s2650_s29  ;;  %v1531_v10 = vmul.f32 %v3038_v11, %v3075_v28  ;;  %v893_v12 = vadd.f32 %v892_v6, %v2936_v5  ;;  %v1130_v5 = vmul.f32 %v2956_v37, %v3104_v15  ;;  %v998_v6 = vpop.f32.mrf.mxu3 }
 0x19a   : > { %v901_v51 = vadd.f32 %v3067_v14, %v3004_v29  ;;  %v3148_v29 = vpop.permute.xlu1 %1266 }
 0x19b   : > { %v931_v13 = vadd.f32 %v930_v57, %v893_v12  ;;  %v3115_v57 = vpop.permute.xlu2 %1423 }
 0x19d   : > { %1547 = vrot.lane.b32.xlu1 %v1528_v22, %s2650_s29  ;;  %v963_v22 = vpop.f32.mrf.mxu2 }
 0x19e   : > { %v964_v23 = vadd.f32 %v963_v22, %v931_v13 }
 0x1a0   : > { %v3079_v24 = vpop.f32.mrf.mxu1  ;;  %v1028_v47 = vpop.f32.mrf.mxu0  ;;  %v999_v61 = vadd.f32 %v998_v6, %v964_v23 }
 0x1a1   : > { %1485 = vrot.lane.b32.xlu0 %v1461_v30, %s2651_s8  ;;  %v1029_v58 = vadd.f32 %v1028_v47, %v993_v56  ;;  %v1534_v30 = vmul.f32 %v2985_v16, %v3104_v15  ;;  %v1202_v56 = vmul.f32 %v2961_v39, %v3047_v53 }
 0x1a2   : > { %v3165_v22 = vpop.permute.xlu1 %1431 }
 0x1a5   : > { %1149 = vrot.lane.b32.xlu1 %v1127_v45, %s2651_s8  ;;  %v1297_v45 = vmul.f32 %v2967_v43, %v3104_v15  ;;  %v968_v8 = vpop.f32.mrf.mxu2 }
 0x1a8   : > { %v1058_v0 = vpop.f32.mrf.mxu1  ;;  %v1032_v60 = vpop.f32.mrf.mxu0 }
 0x1a9   : > { %v1059_v3 = vadd.f32 %v1058_v0, %v1029_v58  ;;  %1310 = vrot.lane.b32.xlu0 %v1291_v59, %s2651_s8  ;;  %v1033_v2 = vadd.f32 %v1032_v60, %v999_v61  ;;  %v1369_v59 = vmul.f32 %v2969_v48, %v3104_v15  ;;  %v935_v0 = vadd.f32 %v3079_v24, %v901_v51  ;;  %v1004_v24 = vpop.f32.mrf.mxu3 }
 0x1ab   : > { %v1071_v27 = vmax.f32 %v1059_v3, 0.0  ;;  %v1200_v3 = vmul.f32 %v2963_v41, %v3075_v28  ;;  %v969_v14 = vadd.f32 %v968_v8, %v935_v0 }
 0x1ad   : > { %v3091_v4 = vmin.f32 %v1071_v27, 6.0  ;;  %1316 = vrot.lane.b32.xlu1 %v1294_v52, %s2651_s8  ;;  %v1462_v52 = vmul.f32 %v2974_v55, %v3104_v15  ;;  %v1005_v21 = vadd.f32 %v1004_v24, %v969_v14  ;;  %v1103_v24 = vmul.f32 %v2940_v31, %v3031_v25 }
 0x1af   : > { %v1125_v44 = vmul.f32 %v2952_v36, %v3091_v4  ;;  %v1364_v36 = vmul.f32 %v2991_v19, %v3091_v4  ;;  %v1457_v19 = vmul.f32 %v3002_v7, %v3091_v4  ;;  %v1529_v7 = vmul.f32 %v2971_v49, %v3091_v4 }
 0x1b0   : > { %v1062_v40 = vpop.f32.mrf.mxu1  ;;  %v1292_v60 = vmul.f32 %v2978_v62, %v3091_v4 }
 0x1b1   : > { %1145 = vrot.lane.b32.xlu2 %v1125_v44, %s2651_s8  ;;  %1388 = vrot.lane.b32.xlu0 %v1366_v50, %s2650_s29  ;;  %v1063_v46 = vadd.f32 %v1062_v40, %v1033_v2  ;;  %v1197_v50 = vmul.f32 %v2950_v35, %v3031_v25 }
 0x1b3   : > { %v1074_v47 = vmax.f32 %v1063_v46, 0.0 }
 0x1b5   : > { %1553 = vrot.lane.b32.xlu1 %v1531_v10, %s2650_s29  ;;  %v3134_v58 = vmin.f32 %v1074_v47, 6.0 }
 0x1b7   : > { %v1128_v49 = vmul.f32 %v2942_v32, %v3134_v58  ;;  %v1036_v32 = vpop.f32.mrf.mxu0  ;;  %v1295_v44 = vmul.f32 %v2958_v38, %v3134_v58  ;;  %v1532_v23 = vmul.f32 %v3038_v11, %v3134_v58  ;;  %v1367_v40 = vmul.f32 %v2983_v1, %v3134_v58 }
 0x1b8   : > { %v1066_v9 = vpop.f32.mrf.mxu1  ;;  %v1037_v10 = vadd.f32 %v1036_v32, %v1005_v21  ;;  %v1102_v1 = vmul.f32 %v2940_v31, %v2989_v18 }
 0x1b9   : > { %1384 = vrot.lane.b32.xlu2 %v1364_v36, %s2650_s29  ;;  %1481 = vrot.lane.b32.xlu0 %v1459_v20, %s2651_s8  ;;  %v1203_v20 = vmul.f32 %v2961_v39, %v3104_v15 }
 0x1ba   : > { %v1067_v12 = vadd.f32 %v1066_v9, %v1037_v10 }
 0x1bc   : > { %v1077_v38 = vmax.f32 %v1067_v12, 0.0 }
 0x1bd   : > { %1155 = vrot.lane.b32.xlu1 %v1130_v5, %s2651_s8 }
 0x1be   : > { %v3171_v5 = vmin.f32 %v1077_v38, 6.0 }
 0x1c0   : > { %v1298_v46 = vmul.f32 %v2967_v43, %v3171_v5 }
 0x1c1   : > { %1477 = vrot.lane.b32.xlu2 %v1457_v19, %s2651_s8  ;;  %1559 = vrot.lane.b32.xlu0 %v1534_v30, %s2650_s29  ;;  %v3178_v19 = vpop.permute.xlu1 %1427  ;;  %v1131_v30 = vmul.f32 %v2956_v37, %v3171_v5  ;;  %v1460_v37 = vmul.f32 %v2965_v42, %v3134_v58  ;;  %v1535_v42 = vmul.f32 %v2985_v16, %v3171_v5 }
 0x1c2   : > { %v1199_v16 = vmul.f32 %v2963_v41, %v3018_v54 }
 0x1c3   : > { %v1142_v26 = vpop.permute.xlu2 %1141 }
 0x1c5   : > { %1322 = vrot.lane.b32.xlu1 %v1297_v45, %s2651_s8 }
 0x1c9   : > { %1549 = vrot.lane.b32.xlu2 %v1529_v7, %s2650_s29  ;;  %1226 = vrot.lane.b32.xlu0 %v1202_v56, %s2650_s29  ;;  %v1370_v7 = vmul.f32 %v2969_v48, %v3171_v5  ;;  %v1463_v48 = vmul.f32 %v2974_v55, %v3171_v5  ;;  %v1104_v55 = vmul.f32 %v2940_v31, %v3091_v4 }
 0x1ca   : > { %v1105_v31 = vmul.f32 %v2944_v33, %v3018_v54 }
 0x1cb   : > { %v3144_v27 = vpop.permute.xlu2 %1308 }
 0x1cd   : > { %1394 = vrot.lane.b32.xlu1 %v1369_v59, %s2650_s29 }
 0x1d1   : > { %1151 = vrot.lane.b32.xlu2 %v1128_v49, %s2651_s8  ;;  %1222 = vrot.lane.b32.xlu0 %v1200_v3, %s2650_s29  ;;  %v1434_v3 = vmul.f32 %v3115_v57, %v2989_v18 }
 0x1d3   : > { %v3159_v13 = vpop.permute.xlu2 %1314 }
 0x1d5   : > { %1487 = vrot.lane.b32.xlu1 %v1462_v52, %s2651_s8 }
 0x1d9   : > { %1318 = vrot.lane.b32.xlu2 %v1295_v44, %s2651_s8  ;;  %1216 = vrot.lane.b32.xlu0 %v1197_v50, %s2650_s29 }
 0x1db   : > { %v3161_v36 = vpop.permute.xlu0 %1380  ;;  %v3175_v61 = vpop.permute.xlu2 %1386 }
 0x1dc   : > { %v3186_v2 = vpop.permute.xlu1 %1214 }
 0x1dd   : > { %1228 = vrot.lane.b32.xlu1 %v1203_v20, %s2650_s29 }
 0x1e1   : > { %1555 = vrot.lane.b32.xlu2 %v1532_v23, %s2650_s29 }
 0x1e3   : > { %v1474_v6 = vpop.permute.xlu0 %1473  ;;  %v3188_v62 = vpop.permute.xlu2 %1479 }
 0x1e5   : > { %1312 = vrot.lane.b32.xlu1 %v1292_v60, %s2651_s8 }
 0x1e9   : > { %1157 = vrot.lane.b32.xlu2 %v1131_v30, %s2651_s8 }
 0x1eb   : > { %v1546_v11 = vpop.permute.xlu0 %1545  ;;  %v3201_v51 = vpop.permute.xlu2 %1320 }
 0x1ed   : > { %1390 = vrot.lane.b32.xlu1 %v1367_v40, %s2650_s29  ;;  %v1436_v40 = vmul.f32 %v3115_v57, %v3091_v4 }
 0x1f1   : > { %1324 = vrot.lane.b32.xlu2 %v1298_v46, %s2651_s8 }
 0x1f3   : > { %v1148_v45 = vpop.permute.xlu0 %1147 }
 0x1f5   : > { %1483 = vrot.lane.b32.xlu1 %v1460_v37, %s2651_s8 }
 0x1f7   : > { %v1144_v47 = vpop.permute.xlu1 %1143 }
 0x1f8   : > { %v1160_v56 = vsel %vm1159_vm14, %v1142_v26, %v1144_v47  ;;  %v3216_v26 = vpop.permute.xlu2 %1557 }
 0x1f9   : > { %v3203_v43 = vadd.f32 %v1160_v56, %v1102_v1  ;;  %1396 = vrot.lane.b32.xlu2 %v1370_v7, %s2650_s29 }
 0x1fb   : > { %v3206_v59 = vpop.permute.xlu0 %1551 }
 0x1fd   : > { %1561 = vrot.lane.b32.xlu1 %v1535_v42, %s2650_s29 }
 0x1ff   : > { %v3211_v0 = vpop.permute.xlu1 %1382 }
 0x201   : > { %1489 = vrot.lane.b32.xlu2 %v1463_v48, %s2651_s8  ;;  %s2664_s8 = smov 114  }
 0x203   : > { %v3218_v49 = vpop.permute.xlu0 %1153 }
 0x207   : > { %v1476_v8 = vpop.permute.xlu1 %1475 }
 0x208   : > { %v1491_v14 = vsel %vm1159_vm14, %v1474_v6, %v1476_v8 }
 0x209   : > { %v1506_v52 = vadd.f32 %v1491_v14, %v1434_v3  ;;  %1220 = vrot.lane.b32.xlu2 %v1199_v16, %s2650_s29  ;;  %v1435_v3 = vmul.f32 %v3115_v57, %v3031_v25  ;;  %v1107_v57 = vmul.f32 %v2944_v33, %v3134_v58 }
 0x20b   : > { %v1146_v32 = vpop.permute.xlu2 %1145  ;;  %v3230_v21 = vpop.permute.xlu0 %1392 }
 0x20c   : > { %v1161_v44 = vsel %vm1159_vm14, %v1144_v47, %v1146_v32  ;;  %v3233_v50 = vadd.f32 %v1146_v32, %v1104_v55 }
 0x20d   : > { %v3235_v9 = vadd.f32 %v1161_v44, %v1103_v24 }
 0x20f   : > { %v1548_v10 = vpop.permute.xlu1 %1547 }
 0x210   : > { %v1563_v12 = vsel %vm1232_vm15, %v1546_v11, %v1548_v10  ;;  %v1269_v11 = vmul.f32 %v2987_v17, %v2989_v18  ;;  %v1272_v18 = vmul.f32 %v2980_v63, %v3018_v54 }
 0x211   : > { %v3238_v20 = vadd.f32 %v1563_v12, %v1506_v52 }
 0x213   : > { %v3240_v38 = vpop.permute.xlu2 %1384  ;;  %v3242_v23 = vpop.permute.xlu0 %1485 }
 0x217   : > { %v1150_v6 = vpop.permute.xlu1 %1149 }
 0x218   : > { %v1162_v60 = vsel %vm1159_vm14, %v1148_v45, %v1150_v6  ;;  %v1398_v45 = vsel %vm1232_vm15, %v3161_v36, %v3211_v0 }
 0x219   : > { %v3247_v30 = vadd.f32 %v1162_v60, %v1105_v31 }
 0x21b   : > { %v1478_v46 = vpop.permute.xlu2 %1477  ;;  %v3253_v37 = vpop.permute.xlu0 %1310 }
 0x21c   : > { %v1508_v1 = vadd.f32 %v1478_v46, %v1436_v40  ;;  %v1326_v47 = vsel %vm1159_vm14, %v3144_v27, %v3253_v37  ;;  %v1492_v27 = vsel %vm1159_vm14, %v1476_v8, %v1478_v46  ;;  %v1437_v8 = vmul.f32 %v3178_v19, %v3018_v54 }
 0x21d   : > { %v1341_v7 = vadd.f32 %v1326_v47, %v1269_v11  ;;  %v1507_v24 = vadd.f32 %v1492_v27, %v1435_v3 }
 0x21f   : > { %v3261_v56 = vpop.permute.xlu1 %1316  ;;  %v1413_v42 = vadd.f32 %v1398_v45, %v1341_v7 }
 0x220   : > { %v1328_v48 = vsel %vm1159_vm14, %v3159_v13, %v3261_v56 }
 0x221   : > { %1596 = vrot.lane.b32.xlu2 %v1413_v42, %s2652_s9  ;;  %v1344_v16 = vadd.f32 %v1328_v48, %v1272_v18 }
 0x223   : > { %v1550_v36 = vpop.permute.xlu2 %1549  ;;  %v3272_v14 = vpop.permute.xlu0 %1388 }
 0x224   : > { %v1564_v52 = vsel %vm1232_vm15, %v1548_v10, %v1550_v36  ;;  %v3275_v55 = vadd.f32 %v1550_v36, %v1508_v1  ;;  %v1400_v13 = vsel %vm1232_vm15, %v3175_v61, %v3272_v14  ;;  %v1106_v10 = vmul.f32 %v2944_v33, %v3075_v28 }
 0x225   : > { %v1416_v32 = vadd.f32 %v1400_v13, %v1344_v16  ;;  %v1579_v44 = vadd.f32 %v1564_v52, %v1507_v24  ;;  %v1108_v33 = vmul.f32 %v2948_v34, %v3047_v53  ;;  %v1110_v13 = vmul.f32 %v2948_v34, %v3171_v5 }
 0x226   : > { %v1109_v24 = vmul.f32 %v2948_v34, %v3104_v15 }
 0x227   : > { %v3280_v12 = vpop.permute.xlu1 %1553  ;;  %1602 = vrot.lane.b32.xlu1 %v1416_v32, %s2652_s9 }
 0x228   : > { %v1565_v54 = vsel %vm1232_vm15, %v3206_v59, %v3280_v12  ;;  %v1275_v59 = vmul.f32 %v3148_v29, %v3047_v53 }
 0x229   : > { %1650 = vrot.lane.b32.xlu2 %v1579_v44, %s2653_s13 }
 0x22b   : > { %v1152_v61 = vpop.permute.xlu2 %1151  ;;  %v3290_v31 = vpop.permute.xlu0 %1481 }
 0x22c   : > { %v1163_v60 = vsel %vm1159_vm14, %v1150_v6, %v1152_v61  ;;  %v3293_v40 = vadd.f32 %v1152_v61, %v1107_v57  ;;  %v1493_v46 = vsel %vm1159_vm14, %v3188_v62, %v3290_v31  ;;  %v1274_v62 = vmul.f32 %v2980_v63, %v3134_v58 }
 0x22d   : > { %v3298_v11 = vadd.f32 %v1163_v60, %v1106_v10  ;;  %v1509_v1 = vadd.f32 %v1493_v46, %v1437_v8 }
 0x22f   : > { %v1156_v47 = vpop.permute.xlu1 %1155  ;;  %v1581_v7 = vadd.f32 %v1565_v54, %v1509_v1 }
 0x230   : > { %v1164_v6 = vsel %vm1159_vm14, %v3218_v49, %v1156_v47 }
 0x231   : > { %v3307_v45 = vadd.f32 %v1164_v6, %v1108_v33  ;;  %1654 = vrot.lane.b32.xlu1 %v1581_v7, %s2653_s13  ;;  %v1273_v6 = vmul.f32 %v2980_v63, %v3075_v28  ;;  %v1438_v63 = vmul.f32 %v3178_v19, %v3075_v28  ;;  %v1441_v28 = vmul.f32 %v3165_v22, %v3104_v15 }
 0x233   : > { %v1319_v42 = vpop.permute.xlu2 %1318  ;;  %v1560_v8 = vpop.permute.xlu0 %1559 }
 0x234   : > { %v3312_v48 = vadd.f32 %v1319_v42, %v1274_v62  ;;  %v1567_v34 = vsel %vm1232_vm15, %v3216_v26, %v1560_v8  ;;  %v1399_v26 = vsel %vm1232_vm15, %v3211_v0, %v3240_v38  ;;  %v402_v0 = vld [vmem:[%s3627_s4 + $0x10] sm:$0xff] }
 0x237   : > { %v1323_v18 = vpop.permute.xlu1 %1322 }
 0x238   : > { %v1330_v27 = vsel %vm1159_vm14, %v3201_v51, %v1323_v18 }
 0x239   : > { %v1347_v3 = vadd.f32 %v1330_v27, %v1275_v59 }
 0x23b   : > { %v1556_v16 = vpop.permute.xlu2 %1555 }
 0x23f   : > { %v1395_v49 = vpop.permute.xlu1 %1394 }
 0x240   : > { %v1402_v36 = vsel %vm1232_vm15, %v3230_v21, %v1395_v49  ;;  %v1440_v21 = vmul.f32 %v3165_v22, %v3047_v53 }
 0x241   : > { %v1419_v52 = vadd.f32 %v1402_v36, %v1347_v3 }
 0x243   : > { %v1158_v32 = vpop.permute.xlu2 %1157  ;;  %1608 = vrot.lane.b32.xlu1 %v1419_v52, %s2652_s9 }
 0x244   : > { %v1165_v44 = vsel %vm1159_vm14, %v1156_v47, %v1158_v32  ;;  %v3326_v57 = vadd.f32 %v1158_v32, %v1110_v13  ;;  %v1270_v47 = vmul.f32 %v2987_v17, %v3031_v25  ;;  %v1566_v13 = vsel %vm1232_vm15, %v3280_v12, %v1556_v16 }
 0x245   : > { %v3328_v51 = vadd.f32 %v1165_v44, %v1109_v24  ;;  %v1204_v44 = vmul.f32 %v2961_v39, %v3171_v5 }
 0x247   : > { %v1488_v10 = vpop.permute.xlu1 %1487 }
 0x248   : > { %v1495_v61 = vsel %vm1159_vm14, %v3242_v23, %v1488_v10 }
 0x249   : > { %v1512_v60 = vadd.f32 %v1495_v61, %v1440_v21 }
 0x24b   : > { %1648 = vrot.lane.b32.xlu1 %v3238_v20, %s2653_s13  ;;  %v1584_v46 = vadd.f32 %v1567_v34, %v1512_v60  ;;  %v1325_v54 = vpop.permute.xlu2 %1324  ;;  %v1329_v20 = vsel %vm1159_vm14, %v3261_v56, %v1319_v42  ;;  %v1439_v56 = vmul.f32 %v3178_v19, %v3134_v58 }
 0x24c   : > { %v1345_v62 = vadd.f32 %v1329_v20, %v1273_v6  ;;  %v1331_v19 = vsel %vm1159_vm14, %v1323_v18, %v1325_v54  ;;  %v1271_v18 = vmul.f32 %v2987_v17, %v3091_v4 }
 0x24d   : > { %1660 = vrot.lane.b32.xlu0 %v1584_v46, %s2653_s13  ;;  %v1198_v46 = vmul.f32 %v2950_v35, %v3091_v4  ;;  %v1277_v35 = vmul.f32 %v3148_v29, %v3171_v5  ;;  %v1201_v4 = vmul.f32 %v2963_v41, %v3134_v58  ;;  %v2261_v41 = vld.sshfl [vmem:[#allocation1] sm:$0xff pattern:$0x75316420]  ;;  %v2262_v58 = vld.sshfl [vmem:[#allocation1 + $0x8] sm:$0xff pattern:$0x75316420] }
 0x24f   : > { %v3339_v1 = vpop.permute.xlu1 %1228  ;;  %v1349_v17 = vadd.f32 %v1325_v54, %v1277_v35 }
 0x253   : > { %v1397_v25 = vpop.permute.xlu2 %1396 }
 0x254   : > { %v1403_v61 = vsel %vm1232_vm15, %v1395_v49, %v1397_v25  ;;  %v401_v49 = vld [vmem:[%s3627_s4 + $0x8] sm:$0xff] }
 0x257   : > { %v1313_v53 = vpop.permute.xlu1 %1312 }
 0x258   : > { %v1327_v23 = vsel %vm1159_vm14, %v3253_v37, %v1313_v53 }
 0x259   : > { %v1342_v33 = vadd.f32 %v1327_v23, %v1270_v47  ;;  %v1421_v23 = vadd.f32 %v1397_v25, %v1349_v17 }
 0x25b   : > { %v1414_v7 = vadd.f32 %v1399_v26, %v1342_v33  ;;  %v2263_v26 = vld.sshfl [vmem:[#allocation1 + $0x10] sm:$0xff pattern:$0x75316420] }
 0x25d   : > { %1598 = vrot.lane.b32.xlu0 %v1414_v7, %s2652_s9 }
 0x25f   : > { %v1391_v59 = vpop.permute.xlu1 %1390 }
 0x260   : > { %v1401_v37 = vsel %vm1232_vm15, %v3272_v14, %v1391_v59  ;;  %v1490_v14 = vpop.permute.xlu2 %1489 }
 0x261   : > { %v1417_v27 = vadd.f32 %v1401_v37, %v1345_v62  ;;  %v1496_v21 = vsel %vm1159_vm14, %v1488_v10, %v1490_v14 }
 0x262   : > { %v1513_v12 = vadd.f32 %v1496_v21, %v1441_v28 }
 0x263   : > { %1604 = vrot.lane.b32.xlu2 %v1417_v27, %s2652_s9 }
 0x265   : > { %1703 = vperm.xlu0 %2556, %v402_v0  }
 0x267   : > { %v1484_v42 = vpop.permute.xlu1 %1483 }
 0x268   : > { %v1494_v3 = vsel %vm1159_vm14, %v3290_v31, %v1484_v42  ;;  %v1511_v36 = vadd.f32 %v1484_v42, %v1439_v56  ;;  %v1276_v31 = vmul.f32 %v3148_v29, %v3104_v15  ;;  %v1343_v15 = vadd.f32 %v1313_v53, %v1271_v18  ;;  %v404_v53 = vld [vmem:[%s3629_s6] sm:$0xf] }
 0x269   : > { %v1510_v52 = vadd.f32 %v1494_v3, %v1438_v63  ;;  %v1418_v29 = vadd.f32 %v1391_v59, %v3312_v48 }
 0x26a   : > { %v1583_v24 = vadd.f32 %v1556_v16, %v1511_v36  ;;  %v1348_v60 = vadd.f32 %v1331_v19, %v1276_v31  ;;  %v1415_v47 = vadd.f32 %v3240_v38, %v1343_v15  ;;  %v1442_v38 = vmul.f32 %v3165_v22, %v3171_v5  ;;  %v1221_v22 = vpop.permute.xlu2 %1220  ;;  %v1227_v5 = vpop.permute.xlu0 %1226 }
 0x26b   : > { %v1582_v32 = vadd.f32 %v1566_v13, %v1510_v52  ;;  %v1237_v21 = vsel %vm1232_vm15, %v1227_v5, %v3339_v1 }
 0x26c   : > { %v1420_v34 = vadd.f32 %v1403_v61, %v1348_v60  ;;  %v1514_v33 = vadd.f32 %v1490_v14, %v1442_v38 }
 0x26d   : > { %1656 = vrot.lane.b32.xlu2 %v1582_v32, %s2653_s13  ;;  %1230 = vrot.lane.b32.xlu0 %v1204_v44, %s2650_s29 }
 0x26f   : > { %v1562_v16 = vpop.permute.xlu1 %1561 }
 0x270   : > { %v1568_v39 = vsel %vm1232_vm15, %v1560_v8, %v1562_v16  ;;  %v400_v8 = vld [vmem:[%s3627_s4] sm:$0xff]  ;;  %v1586_v54 = vadd.f32 %v1562_v16, %v1514_v33  ;;  %v1254_v16 = vadd.f32 %v1237_v21, %v3307_v45 }
 0x271   : > { %v1585_v10 = vadd.f32 %v1568_v39, %v1513_v12 }
 0x272   : > { %v3411_v7 = vpop.permute.xlu0 %1222 }
 0x273   : > { %1662 = vrot.lane.b32.xlu1 %v1585_v10, %s2653_s13  ;;  %v1235_v39 = vsel %vm1232_vm15, %v1221_v22, %v3411_v7 }
 0x275   : > { %1610 = vrot.lane.b32.xlu2 %v1420_v34, %s2652_s9  ;;  %1218 = vrot.lane.b32.xlu0 %v1198_v46, %s2650_s29 }
 0x27a   : > { %v1217_v6 = vpop.permute.xlu0 %1216 }
 0x27b   : > { %1698 = vperm.xlu1 %2558, %v401_v49   ;;  %v1597_v48 = vpop.permute.xlu2 %1596  ;;  %v1233_v63 = vsel %vm1232_vm15, %v3186_v2, %v1217_v6  ;;  %v403_v2 = vld [vmem:[%s3628_s5] sm:$0xf] }
 0x27c   : > { %v1248_v14 = vadd.f32 %v1233_v63, %v3203_v43  ;;  %v1740_v12 = vsel %vm1738_vm2, %v403_v2, 0 }
 0x27d   : > { %1693 = vperm.xlu2 %2559, %v400_v8   ;;  %1600 = vrot.lane.b32.xlu0 %v1415_v47, %s2652_s9  ;;  %v3445_v34 = vand.u32 4294901760, %v1740_v12 }
 0x27f   : > { %v3459_v33 = vsub.f32 %v1740_v12, %v3445_v34 }
 0x283   : > { %1224 = vrot.lane.b32.xlu1 %v1201_v4, %s2650_s29  ;;  %v3413_v20 = vpop.permute.xlu2 %1650 }
 0x285   : > { %1612 = vrot.lane.b32.xlu2 %v1421_v23, %s2652_s9  ;;  %1735 = vperm.xlu0 %2556, %v404_v53  }
 0x28b   : > { %1606 = vrot.lane.b32.xlu1 %v1418_v29, %s2652_s9 }
 0x28d   : > { %1664 = vrot.lane.b32.xlu2 %v1586_v54, %s2653_s13  ;;  %2264 = vrot.lane.b32.xlu0 %v2261_v41, %s2654_s22 }
 0x293   : > { %1658 = vrot.lane.b32.xlu1 %v1583_v24, %s2653_s13 }
 0x295   : > { %1652 = vrot.lane.b32.xlu2 %v3275_v55, %s2653_s13  ;;  %s269_s13 = sand.u32 1, %s2614_s25  }
 0x296   : > { %s2441_s14 = sshll.u32 %s269_s13, 3 }
 0x297   : > { %s3552_s17 = scalar_lea.vmem [#allocation3], %s2441_s14  ;;  %s2665_s14 = smov 98  }
 0x299   : > { %v1603_v25 = vpop.permute.xlu1 %1602 }
 0x29b   : > { %2266 = vrot.lane.b32.xlu1 %v2262_v58, %s2654_s22 }
 0x29d   : > { %2268 = vrot.lane.b32.xlu2 %v2263_v26, %s2654_s22  ;;  %s2662_s22 = smov 104  }
 0x2a3   : > { %v1655_v27 = vpop.permute.xlu1 %1654 }
 0x2b5   : > { %v1609_v56 = vpop.permute.xlu1 %1608 }
 0x2bd   : > { %v3415_v62 = vpop.permute.xlu2 %1604  ;;  %v1649_v52 = vpop.permute.xlu1 %1648 }
 0x2be   : > { %v1667_v24 = vsel %vm1666_vm1, %v1649_v52, %v3413_v20  ;;  %v1617_v15 = vsel %vm1614_vm0, %v1603_v25, %v3415_v62 }
 0x2bf   : > { %v1661_v59 = vpop.permute.xlu0 %1660 }
 0x2c7   : > { %v3417_v37 = vpop.permute.xlu2 %1656 }
 0x2c8   : > { %v1669_v35 = vsel %vm1666_vm1, %v1655_v27, %v3417_v37 }
 0x2cf   : > { %v1611_v55 = vpop.permute.xlu2 %1610  ;;  %v3419_v0 = vpop.permute.xlu0 %1598 }
 0x2d0   : > { %v1615_v36 = vsel %vm1614_vm0, %v1597_v48, %v3419_v0  ;;  %v1619_v19 = vsel %vm1614_vm0, %v1609_v56, %v1611_v55 }
 0x2d1   : > { %v1630_v13 = vadd.f32 %v1615_v36, %v1248_v14  ;;  %v1636_v60 = vadd.f32 %v1619_v19, %v1254_v16 }
 0x2d3   : > { %v1682_v28 = vadd.f32 %v1667_v24, %v1630_v13 }
 0x2d7   : > { %v3423_v42 = vpop.permute.xlu2 %1693  ;;  %v3425_v3 = vpop.permute.xlu0 %1703 }
 0x2d8   : > { %v1706_v31 = vadd.f32 %v3423_v42, %v1682_v28 }
 0x2da   : > { %v1715_v46 = vmax.f32 %v1706_v31, 0.0 }
 0x2dc   : > { %v1724_v54 = vmin.f32 %v1715_v46, 6.0 }
 0x2de   : > { %v3468_v25 = vand.u32 4294901760, %v1724_v54 }
 0x2df   : > { %v1613_v32 = vpop.permute.xlu2 %1612  ;;  %v1231_v44 = vpop.permute.xlu0 %1230 }
 0x2e0   : > { %v1238_v43 = vsel %vm1232_vm15, %v3339_v1, %v1231_v44  ;;  %v1620_v18 = vsel %vm1614_vm0, %v1611_v55, %v1613_v32  ;;  %v1256_v26 = vadd.f32 %v1231_v44, %v3326_v57 }
 0x2e1   : > { %v1255_v61 = vadd.f32 %v1238_v43, %v3328_v51  ;;  %v1251_v51 = vadd.f32 %v1235_v39, %v3247_v30 }
 0x2e2   : > { %v1638_v63 = vadd.f32 %v1613_v32, %v1256_v26  ;;  %v1796_v32 = vsub.f32 %v1724_v54, %v3468_v25 }
 0x2e3   : > { %v1637_v45 = vadd.f32 %v1620_v18, %v1255_v61  ;;  %v1633_v29 = vadd.f32 %v1617_v15, %v1251_v51 }
 0x2e5   : > { %v1663_v10 = vpop.permute.xlu1 %1662  ;;  %v1685_v58 = vadd.f32 %v1669_v35, %v1633_v29 }
 0x2e6   : > { %v1671_v1 = vsel %vm1666_vm1, %v1661_v59, %v1663_v10 }
 0x2e7   : > { %v1688_v49 = vadd.f32 %v1671_v1, %v1636_v60  ;;  %v1665_v8 = vpop.permute.xlu2 %1664  ;;  %v1219_v47 = vpop.permute.xlu0 %1218 }
 0x2e8   : > { %v1672_v17 = vsel %vm1666_vm1, %v1663_v10, %v1665_v8  ;;  %v1234_v4 = vsel %vm1232_vm15, %v1217_v6, %v1219_v47  ;;  %v3466_v6 = vand.u32 4294901760, %v3459_v33  ;;  %v1690_v44 = vadd.f32 %v1665_v8, %v1638_v63 }
 0x2e9   : > { %v1712_v53 = vadd.f32 %v3425_v3, %v1688_v49  ;;  %v1689_v23 = vadd.f32 %v1672_v17, %v1637_v45  ;;  %v1249_v38 = vadd.f32 %v1234_v4, %v3235_v9  ;;  %v1250_v28 = vadd.f32 %v1219_v47, %v3233_v50 }
 0x2ea   : > { %v1764_v13 = vsub.f32 %v3459_v33, %v3466_v6  ;;  %v1797_v10 = vand.u32 4294901760, %v1796_v32  ;;  %v1714_v46 = vadd.f32 %v3425_v3, %v1690_v44 }
 0x2eb   : > { %v1721_v41 = vmax.f32 %v1712_v53, 0.0  ;;  %v1713_v30 = vadd.f32 %v3425_v3, %v1689_v23 }
 0x2ec   : > { %v3489_v61 = vand.u32 4294901760, %v1764_v13  ;;  %v1798_v47 = vsub.f32 %v1796_v32, %v1797_v10  ;;  %v1723_v51 = vmax.f32 %v1714_v46, 0.0 }
 0x2ed   : > { %v1730_v22 = vmin.f32 %v1721_v41, 6.0  ;;  %v1722_v5 = vmax.f32 %v1713_v30, 0.0  ;;  %v3463_v48 = vpop.permute.xlu1 %1698 }
 0x2ee   : > { %v1709_v9 = vadd.f32 %v3463_v48, %v1685_v58  ;;  %v1799_v53 = vand.u32 4294901760, %v1798_v47  ;;  %v1732_v23 = vmin.f32 %v1723_v51, 6.0 }
 0x2ef   : > { %v1731_v59 = vmin.f32 %v1722_v5, 6.0  ;;  %v1653_v27 = vpop.permute.xlu2 %1652  ;;  %v1601_v55 = vpop.permute.xlu0 %1600  ;;  %v3471_v56 = vand.u32 4294901760, %v1730_v22 }
 0x2f0   : > { %v1718_v36 = vmax.f32 %v1709_v9, 0.0  ;;  %v1616_v57 = vsel %vm1614_vm0, %v3419_v0, %v1601_v55  ;;  %v1668_v21 = vsel %vm1666_vm1, %v3413_v20, %v1653_v27  ;;  %v1632_v12 = vadd.f32 %v1601_v55, %v1250_v28 }
 0x2f1   : > { %v1631_v14 = vadd.f32 %v1616_v57, %v1249_v38  ;;  %1756 = vmatpush.msra.mxu2 %v3471_v56  ;;  %v3476_v52 = vand.u32 4294901760, %v1731_v59  ;;  %v1784_v24 = vsub.f32 %v1730_v22, %v3471_v56 }
 0x2f2   : > { %v1727_v2 = vmin.f32 %v1718_v36, 6.0  ;;  %v1684_v8 = vadd.f32 %v1653_v27, %v1632_v12 }
 0x2f3   : > { %v1683_v0 = vadd.f32 %v1668_v21, %v1631_v14  ;;  %1928 = vmatpush.msrb.mxu0 %v3476_v52  ;;  %v1785_v43 = vand.u32 4294901760, %v1784_v24  ;;  %v3487_v19 = vsub.f32 %v1731_v59, %v3476_v52 }
 0x2f4   : > { %v1757_v31 = vand.u32 4294901760, %v1727_v2  ;;  %v1708_v3 = vadd.f32 %v3423_v42, %v1684_v8 }
 0x2f5   : > { %v1225_v16 = vpop.permute.xlu1 %1224  ;;  %v1786_v39 = vsub.f32 %v1784_v24, %v1785_v43  ;;  %v1957_v60 = vand.u32 4294901760, %v3487_v19  ;;  %v1707_v17 = vadd.f32 %v3423_v42, %v1683_v0  ;;  %v3509_v42 = vand.u32 4294901760, %v1732_v23 }
 0x2f6   : > { %v1236_v20 = vsel %vm1232_vm15, %v3411_v7, %v1225_v16  ;;  %1758 = vmatpush.msra.mxu2 %v1757_v31  ;;  %v1790_v50 = vsub.f32 %v1727_v2, %v1757_v31  ;;  %v1717_v29 = vmax.f32 %v1708_v3, 0.0  ;;  %v1253_v41 = vadd.f32 %v1225_v16, %v3293_v40 }
 0x2f7   : > { %v1252_v18 = vadd.f32 %v1236_v20, %v3298_v11  ;;  %v1787_v1 = vand.u32 4294901760, %v1786_v39  ;;  %v1958_v15 = vsub.f32 %v3487_v19, %v1957_v60  ;;  %v1716_v54 = vmax.f32 %v1707_v17, 0.0 }
 0x2f8   : > { %1760 = vmatpush.msra.mxu2 %v3468_v25  ;;  %v1791_v49 = vand.u32 4294901760, %v1790_v50  ;;  %v1726_v30 = vmin.f32 %v1717_v29, 6.0  ;;  %v2128_v40 = vsub.f32 %v1732_v23, %v3509_v42 }
 0x2f9   : > { %1766 = vmatmul.f32.vlgmr.msra.gmra.mxu2 %v3489_v61  ;;  %1788 = vmatpush.msra.mxu3 %v1787_v1  ;;  %v1959_v7 = vand.u32 4294901760, %v1958_v15  ;;  %v1725_v26 = vmin.f32 %v1716_v54, 6.0 }
 0x2fa   : > { %1821 = vmatpush.msrb.mxu2 %v1784_v24  ;;  %v1792_v45 = vsub.f32 %v1790_v50, %v1791_v49  ;;  %v3519_v55 = vand.u32 4294901760, %v1726_v30  ;;  %v2129_v57 = vand.u32 4294901760, %v2128_v40 }
 0x2fb   : > { %1960 = vmatpush.msrb.mxu1 %v1959_v7 }
 0x2fc   : > { %1824 = vmatpush.msrb.mxu2 %v1790_v50  ;;  %v1793_v11 = vand.u32 4294901760, %v1792_v45  ;;  %v2140_v13 = vsub.f32 %v1726_v30, %v3519_v55  ;;  %v2130_v2 = vsub.f32 %v2128_v40, %v2129_v57 }
 0x2fd   : > { %v1607_v35 = vpop.permute.xlu1 %1606 }
 0x2fe   : > { %v1618_v4 = vsel %vm1614_vm0, %v3415_v62, %v1607_v35  ;;  %1827 = vmatpush.msrb.mxu2 %v1796_v32  ;;  %1794 = vmatpush.msra.mxu3 %v1793_v11  ;;  %v1635_v62 = vadd.f32 %v1607_v35, %v1253_v41  ;;  %v2141_v28 = vand.u32 4294901760, %v2140_v13 }
 0x2ff   : > { %v1634_v38 = vadd.f32 %v1618_v4, %v1252_v18 }
 0x300   : > { %1876 = vmatpush.msra.mxu2 %v1785_v43  ;;  %1800 = vmatpush.msra.mxu3 %v1799_v53  ;;  %v2131_v43 = vand.u32 4294901760, %v2130_v2  ;;  %v2142_v39 = vsub.f32 %v2140_v13, %v2141_v28 }
 0x301   : > { %1802 = vmatmul.f32.vlgmr.msra.gmra.mxu3 %v3445_v34  ;;  %1830 = vmatmul.f32.vlgmr.msrb.gmra.mxu2 %v3459_v33 }
 0x302   : > { %1880 = vmatpush.msra.mxu2 %v1791_v49  ;;  %1848 = vmatpush.msrb.mxu3 %v3471_v56  ;;  %v2143_v46 = vand.u32 4294901760, %v2142_v39 }
 0x304   : > { %1884 = vmatpush.msra.mxu2 %v1797_v10  ;;  %1850 = vmatpush.msrb.mxu3 %v1757_v31 }
 0x305   : > { %v1659_v58 = vpop.permute.xlu1 %1658 }
 0x306   : > { %1993 = vmatpush.msrb.mxu2 %v3487_v19  ;;  %v1670_v22 = vsel %vm1666_vm1, %v3417_v37, %v1659_v58  ;;  %v1687_v5 = vadd.f32 %v1659_v58, %v1635_v62  ;;  %1852 = vmatpush.msrb.mxu3 %v3468_v25  ;;  %v1931_v37 = vand.u32 4294901760, %v1725_v26  ;;  %v2269_v58 = vpop.permute.xlu2 %2268 }
 0x307   : > { %v1686_v9 = vadd.f32 %v1670_v22, %v1634_v38 }
 0x308   : > { %1904 = vmatpush.msra.mxu3 %v3471_v56  ;;  %v1711_v59 = vadd.f32 %v3463_v48, %v1687_v5  ;;  %v1968_v24 = vsub.f32 %v1725_v26, %v1931_v37 }
 0x309   : > { %v1710_v27 = vadd.f32 %v3463_v48, %v1686_v9  ;;  %1856 = vmatmul.f32.vlgmr.msrb.gmra.mxu3 %v3466_v6  ;;  %1886 = vmatmul.f32.vlgmr.msra.gmra.mxu2 %v3445_v34 }
 0x30a   : > { %1906 = vmatpush.msra.mxu3 %v1757_v31  ;;  %v1720_v63 = vmax.f32 %v1711_v59, 0.0  ;;  %v1969_v0 = vand.u32 4294901760, %v1968_v24 }
 0x30b   : > { %v1719_v36 = vmax.f32 %v1710_v27, 0.0 }
 0x30c   : > { %1908 = vmatpush.msra.mxu3 %v3468_v25  ;;  %v1729_v14 = vmin.f32 %v1720_v63, 6.0  ;;  %v1970_v50 = vsub.f32 %v1968_v24, %v1969_v0 }
 0x30d   : > { %v1728_v56 = vmin.f32 %v1719_v36, 6.0  ;;  %v2267_v47 = vpop.permute.xlu1 %2266 }
 0x30e   : > { %2020 = vmatpush.msrb.mxu3 %v3476_v52  ;;  %v2101_v48 = vand.u32 4294901760, %v1729_v14  ;;  %v1971_v19 = vand.u32 4294901760, %v1970_v50  ;;  %v2272_v5 = vsel %vm2270_vm3, %v2267_v47, %v2269_v58 }
 0x30f   : > { %v1929_v44 = vand.u32 4294901760, %v1728_v56 }
 0x310   : > { %v2134_v21 = vsub.f32 %v1729_v14, %v2101_v48 }
 0x311   : > { %1930 = vmatpush.msrb.mxu0 %v1929_v44  ;;  %2022 = vmatpush.msrb.mxu3 %v1929_v44  ;;  %v1962_v32 = vsub.f32 %v1728_v56, %v1929_v44 }
 0x312   : > { %1910 = vmatmul.f32.vlgmr.msra.gmra.mxu3 %v3445_v34  ;;  %v2135_v25 = vand.u32 4294901760, %v2134_v21 }
 0x313   : > { %1932 = vmatpush.msrb.mxu0 %v1931_v37  ;;  %1996 = vmatpush.msrb.mxu2 %v1962_v32  ;;  %v1963_v31 = vand.u32 4294901760, %v1962_v32 }
 0x314   : > { %2024 = vmatpush.msrb.mxu3 %v1931_v37  ;;  %1938 = vmatmul.f32.vlgmr.msrb.gmra.mxu0 %v3489_v61  ;;  %v2136_v12 = vsub.f32 %v2134_v21, %v2135_v25 }
 0x315   : > { %2048 = vmatpush.msra.mxu0 %v1957_v60  ;;  %v1964_v16 = vsub.f32 %v1962_v32, %v1963_v31  ;;  %1999 = vmatpush.msrb.mxu2 %v1968_v24  ;;  %v1736_v60 = vpop.permute.xlu0 %1735 }
 0x316   : > { %2132 = vmatpush.msra.mxu3 %v2131_v43  ;;  %v2137_v20 = vand.u32 4294901760, %v2136_v12  ;;  %2002 = vmatmul.f32.vlgmr.msrb.gmra.mxu2 %v3459_v33 }
 0x317   : > { %2052 = vmatpush.msra.mxu0 %v1963_v31  ;;  %v1965_v10 = vand.u32 4294901760, %v1964_v16  ;;  %2100 = vmatpush.msra.mxu2 %v3509_v42 }
 0x318   : > { %2138 = vmatpush.msra.mxu3 %v2137_v20 }
 0x319   : > { %2056 = vmatpush.msra.mxu0 %v1969_v0  ;;  %1966 = vmatpush.msrb.mxu1 %v1965_v10 }
 0x31a   : > { %2102 = vmatpush.msra.mxu2 %v2101_v48  ;;  %2028 = vmatmul.f32.vlgmr.msrb.gmra.mxu3 %v3466_v6 }
 0x31b   : > { %2165 = vmatpush.msrb.mxu0 %v2128_v40  ;;  %2144 = vmatpush.msra.mxu3 %v2143_v46 }
 0x31c   : > { %2104 = vmatpush.msra.mxu2 %v3519_v55  ;;  %1972 = vmatpush.msrb.mxu1 %v1971_v19 }
 0x31d   : > { %2168 = vmatpush.msrb.mxu0 %v2134_v21  ;;  %2248 = vmatpush.msrb.mxu3 %v3509_v42 }
 0x31e   : > { %2220 = vmatpush.msrb.mxu2 %v2129_v57  ;;  %1974 = vmatmul.f32.vlgmr.msrb.gmra.mxu1 %v3445_v34 }
 0x31f   : > { %2076 = vmatpush.msra.mxu1 %v3476_v52  ;;  %2171 = vmatpush.msrb.mxu0 %v2140_v13 }
 0x320   : > { %2224 = vmatpush.msrb.mxu2 %v2135_v25  ;;  %2250 = vmatpush.msrb.mxu3 %v2101_v48 }
 0x321   : > { %2078 = vmatpush.msra.mxu1 %v1929_v44  ;;  %2110 = vmatmul.f32.vlgmr.msra.gmra.mxu2 %v3489_v61 }
 0x322   : > { %2228 = vmatpush.msrb.mxu2 %v2141_v28  ;;  %2252 = vmatpush.msrb.mxu3 %v3519_v55 }
 0x323   : > { %2080 = vmatpush.msra.mxu1 %v1931_v37  ;;  %2058 = vmatmul.f32.vlgmr.msra.gmra.mxu0 %v3445_v34 }
 0x324   : > { %2146 = vmatmul.f32.vlgmr.msra.gmra.mxu3 %v3445_v34 }
 0x325   : > { %2192 = vmatpush.msrb.mxu1 %v3509_v42 }
 0x326   : > { %2082 = vmatmul.f32.vlgmr.msra.gmra.mxu1 %v3445_v34 }
 0x327   : > { %2194 = vmatpush.msrb.mxu1 %v2101_v48 }
 0x329   : > { %2196 = vmatpush.msrb.mxu1 %v3519_v55  ;;  %2230 = vmatmul.f32.vlgmr.msrb.gmra.mxu2 %v3445_v34 }
 0x32b   : > { %2174 = vmatmul.f32.vlgmr.msrb.gmra.mxu0 %v3459_v33  ;;  %v2265_v33 = vpop.permute.xlu0 %2264 }
 0x32c   : > { %2254 = vmatmul.f32.vlgmr.msrb.gmra.mxu3 %v3445_v34 }
 0x32e   : > { %2200 = vmatmul.f32.vlgmr.msrb.gmra.mxu1 %v3466_v6  ;;  %v2271_v6 = vsel %vm2270_vm3, %v2265_v33, %v2267_v47 }
 0x37c   : > { %v1767_v52 = vpop.f32.mrf.mxu2 }
 0x37d   : > { %v1768_v1 = vadd.f32 %v1767_v52, %v1736_v60 }
 0x384   : > { %v1803_v61 = vpop.f32.mrf.mxu3  ;;  %v1831_v18 = vpop.f32.mrf.mxu2 }
 0x385   : > { %v1804_v15 = vadd.f32 %v1803_v61, %v1768_v1 }
 0x387   : > { %v1832_v8 = vadd.f32 %v1831_v18, %v1804_v15 }
 0x38c   : > { %v1857_v49 = vpop.f32.mrf.mxu3  ;;  %v1887_v45 = vpop.f32.mrf.mxu2 }
 0x38d   : > { %v1858_v7 = vadd.f32 %v1857_v49, %v1832_v8 }
 0x38f   : > { %v1888_v51 = vadd.f32 %v1887_v45, %v1858_v7 }
 0x391   : > { %v1939_v3 = vpop.f32.mrf.mxu0 }
 0x392   : > { %v1940_v17 = vadd.f32 %v1939_v3, %v1736_v60 }
 0x395   : > { %v1911_v34 = vpop.f32.mrf.mxu3 }
 0x396   : > { %v1912_v11 = vadd.f32 %v1911_v34, %v1888_v51 }
 0x398   : > { %v2276_v35 = vadd.f32 %v2271_v6, %v1912_v11 }
 0x399   : > { %v2003_v4 = vpop.f32.mrf.mxu2 }
 0x39a   : > { %2292 = vrot.lane.b32.xlu0 %v2276_v35, %s2655_s15  ;;  %2287 = vrot.lane.b32.xlu1 %v2276_v35, %s2656_s16  ;;  %2280 = vst.msk [vmem:[%s3552_s17] sm:$0xf] %vm2279_vm4, %v2276_v35  ;;  %s2666_s15 = smov 116   ;;  %s2667_s16 = smov 102  }
 0x39b   : > { %v1975_v53 = vpop.f32.mrf.mxu1  ;;  %2282 = vrot.lane.b32.xlu2 %v2276_v35, %s2650_s29  ;;  %s2658_s29 = smov 112  }
 0x39c   : > { %v1976_v23 = vadd.f32 %v1975_v53, %v1940_v17 }
 0x39d   : > { %v2029_v38 = vpop.f32.mrf.mxu3 }
 0x39e   : > { %v2004_v29 = vadd.f32 %v2003_v4, %v1976_v23 }
 0x3a0   : > { %v2030_v54 = vadd.f32 %v2029_v38, %v2004_v29  ;;  %v2059_v41 = vpop.f32.mrf.mxu0 }
 0x3a2   : > { %v2060_v42 = vadd.f32 %v2059_v41, %v2030_v54  ;;  %2297 = vrot.lane.b32.xlu0 %v2276_v35, %s2657_s18 }
 0x3a3   : > { %v2083_v62 = vpop.f32.mrf.mxu1 }
 0x3a4   : > { %v2111_v30 = vpop.f32.mrf.mxu2  ;;  %v2084_v26 = vadd.f32 %v2083_v62, %v2060_v42 }
 0x3a5   : > { %v2112_v22 = vadd.f32 %v2111_v30, %v1736_v60 }
 0x3a6   : > { %v2277_v40 = vadd.f32 %v2272_v5, %v2084_v26 }
 0x3a7   : > { %v2147_v9 = vpop.f32.mrf.mxu3 }
 0x3a8   : > { %v2148_v59 = vadd.f32 %v2147_v9, %v2112_v22  ;;  %v2175_v27 = vpop.f32.mrf.mxu0  ;;  %2323 = vrot.lane.b32.xlu1 %v2277_v40, %s2658_s29  ;;  %2331 = vrot.lane.b32.xlu2 %v2277_v40, %s2659_s19  ;;  %v2313_v48 = vrot.slane %v2277_v40, 4 }
 0x3aa   : > { %v2176_v55 = vadd.f32 %v2175_v27, %v2148_v59  ;;  %2302 = vrot.lane.b32.xlu0 %v2276_v35, %s2660_s20  ;;  %v2314_v2 = vsel %vm438_vm11, %v2276_v35, %v2313_v48  ;;  %s2375_s20 = sshll.u32 %s3552_s17, 4  ;;  %s2376_s20 = int_to_ptr.vmem [resolvable:$true] %s2375_s20 }
 0x3ab   : > { %v2201_v63 = vpop.f32.mrf.mxu1 }
 0x3ac   : > { %v2231_v37 = vpop.f32.mrf.mxu2  ;;  %v2202_v36 = vadd.f32 %v2201_v63, %v2176_v55 }
 0x3ae   : > { %v2232_v57 = vadd.f32 %v2231_v37, %v2202_v36 }
 0x3af   : > { %v2255_v14 = vpop.f32.mrf.mxu3 }
 0x3b0   : > { %v2256_v56 = vadd.f32 %v2255_v14, %v2232_v57  ;;  %2335 = vrot.lane.b32.xlu1 %v2277_v40, %s2661_s21  ;;  %2339 = vrot.lane.b32.xlu2 %v2277_v40, %s2662_s22 }
 0x3b2   : > { %2327 = vrot.lane.b32.xlu0 %v2277_v40, %s2652_s9  ;;  %v2278_v13 = vadd.f32 %v2269_v58, %v2256_v56  ;;  %s2450_s9 = sshll.u32 %s2729_s28, 3  ;;  %s2362_s28 = scalar_lea.sflag [#allocation4], %s269_s13 }
 0x3b3   : > { %s2373_s19 = scalar_lea.hbm %s3630_s7, %s2450_s9 }
 0x3b4   : > { %v2348_v24 = vrot.slane %v2278_v13, 4  ;;  %s2377_s21 = sshll.u32 %s2373_s19, 4  ;;  %s2378_s21 = int_to_ptr.hbm [resolvable:$true] %s2377_s21 }
 0x3b5   : > { %s2574_s22 = sshra.s32 %s2378_s21, 4  ;;  %s2575_s22 = int_to_ptr.hbm [resolvable:$true] %s2574_s22 }
 0x3b6   : > { %v2349_v44 = vsel %vm438_vm11, %v2277_v40, %v2348_v24  ;;  %vm2318_vm11 = vcmask 932864   ;;  %p2581_p0 = scmp.lt.s32.totalorder %s2575_s22, %s3630_s7 }
 0x3b8   : > { %2350 = vrot.lane.b32.xlu2 %v2349_v44, %s2663_s23  ;;  %2315 = vrot.lane.b32.xlu1 %v2314_v2, %s2664_s8  ;;  %s2576_s23 = scalar_lea.hbm %s2575_s22, 8 }
 0x3b9   : > { %p2577_p11 = scmp.ne.s32.totalorder %s2575_s22, %s2576_s23 }
 0x3ba   : > { %2357 = vrot.lane.b32.xlu0 %v2278_v13, %s2665_s14 }
 0x3bb   : > { %p2578_p12 = pnand %p2577_p11, %p2746_p5 }
 0x3bd   : > { %p2579_p13 = pneg %p2578_p12 }
 0x3c0   : > { %2307 = vrot.lane.b32.xlu2 %v2276_v35, %s2666_s15  ;;  %2343 = vrot.lane.b32.xlu1 %v2277_v40, %s2667_s16  ;;  %s2580_s15 = scalar_lea.hbm %s3630_s7, 16 }
 0x3c1   : > { %p2582_p1 = scmp.lt.s32.totalorder %s2580_s15, %s2576_s23 }
 0x3c3   : > { %p2583_p2 = por %p2582_p1, %p2581_p0 }
 0x3c5   : > { %p2584_p3 = pnand %p2583_p2, %p2579_p13 }
 0x3f5   : > { %v2283_v21 = vpop.permute.xlu2 %2282 }
 0x3f6   : > { %2286 = vst.msk [vmem:[%s3552_s17] sm:$0xf] %vm2285_vm5, %v2283_v21 }
 0x402   : > { %v2332_v32 = vpop.permute.xlu2 %2331 }
 0x40a   : > { %v2340_v28 = vpop.permute.xlu2 %2339 }
 0x40c   : > { %v2293_v0 = vpop.permute.xlu0 %2292  ;;  %v2288_v25 = vpop.permute.xlu1 %2287 }
 0x40d   : > { %2291 = vst.msk [vmem:[%s3552_s17] sm:$0xf] %vm2290_vm6, %v2288_v25 }
 0x40e   : > { %2296 = vst.msk [vmem:[%s3552_s17] sm:$0xf] %vm2295_vm7, %v2293_v0 }
 0x412   : > { %v2351_v43 = vpop.permute.xlu2 %2350 }
 0x413   : > { %v2352_v52 = vrot.slane %v2351_v43, 4 }
 0x414   : > { %v2298_v31 = vpop.permute.xlu0 %2297 }
 0x415   : > { %2301 = vst.msk [vmem:[%s3552_s17] sm:$0xf] %vm2300_vm8, %v2298_v31  ;;  %v2354_v60 = vsel %vm2353_vm13, %v2351_v43, %v2352_v52 }
 0x41a   : > { %v2324_v12 = vpop.permute.xlu1 %2323  ;;  %v2308_v39 = vpop.permute.xlu2 %2307 }
 0x41b   : > { %2326 = vst.msk [vmem:[%s3552_s17 + $0x4] sm:$0xf] %vm2279_vm4, %v2324_v12 }
 0x41c   : > { %v2303_v16 = vpop.permute.xlu0 %2302 }
 0x41d   : > { %2306 = vst.msk [vmem:[%s3552_s17] sm:$0xf] %vm2305_vm9, %v2303_v16 }
 0x41e   : > { %2311 = vst.msk [vmem:[%s3552_s17] sm:$0xf] %vm2310_vm10, %v2308_v39 }
 0x422   : > { %v2336_v20 = vpop.permute.xlu1 %2335 }
 0x424   : > { %v2328_v50 = vpop.permute.xlu0 %2327 }
 0x425   : > { %2330 = vst.msk [vmem:[%s3552_s17 + $0x4] sm:$0xf] %vm2285_vm5, %v2328_v50 }
 0x426   : > { %2334 = vst.msk [vmem:[%s3552_s17 + $0x4] sm:$0xf] %vm2290_vm6, %v2332_v32 }
 0x427   : > { %2338 = vst.msk [vmem:[%s3552_s17 + $0x4] sm:$0xf] %vm2295_vm7, %v2336_v20 }
 0x428   : > { %2342 = vst.msk [vmem:[%s3552_s17 + $0x4] sm:$0xf] %vm2300_vm8, %v2340_v28 }
 0x42a   : > { %v2316_v10 = vpop.permute.xlu1 %2315 }
 0x42b   : > { %v2317_v46 = vrot.slane %v2316_v10, 4 }
 0x42c   : > { %v2358_v18 = vpop.permute.xlu0 %2357 }
 0x42d   : > { %v2319_v19 = vsel %vm2318_vm11, %v2316_v10, %v2317_v46 }
 0x42e   : > { %2322 = vst.msk [vmem:[%s3552_s17] sm:$0xf] %vm2321_vm12, %v2319_v19 }
 0x432   : > { %v2344_v61 = vpop.permute.xlu1 %2343 }
 0x433   : > { %2346 = vst.msk [vmem:[%s3552_s17 + $0x4] sm:$0xf] %vm2305_vm9, %v2344_v61 }
 0x434   : > { %2356 = vst.msk [vmem:[%s3552_s17 + $0x4] sm:$0xf] %vm2310_vm10, %v2354_v60 }
 0x435   : > { %2360 = vst.msk [vmem:[%s3552_s17 + $0x4] sm:$0xf] %vm2321_vm12, %v2358_v18 }
 0x436   : > { %2587 = shalt.err (!%p2584_p3)
}
 0x437   : > { %2451 = dma.vmem_to_hbm [thread:$0]  (%p2746_p5), %s2376_s20, 128, %s2378_s21, %s2362_s28  }
 0x438 PF: > { %p2457_p4 = scmp.ge.s32.totalorder %s2622_s27, 2  ;;  %s2389_s13 = sand.u32 1, %s2610_s24  }
 0x439   : > { %s2390_s17 = scalar_lea.sflag [#allocation4], %s2389_s13 }
 0x43a   : > { %p2454_p7 = pnand %p2457_p4, %p2750_p6 }
 0x43c   : > { %p2455_p8 = pneg %p2454_p7 }
 0x43e   : > { %2605 = dma.done.wait (%p2455_p8), %s2390_s17, 128  }
 0x43f   : > { %2607 = vsyncadd (%p2455_p8), %s2390_s17, 4294967168  ;;  %p17_p9 = scmp.ge.s32.totalorder %s2733_s30, 4   ;;  %s3633_s24 = smov %s2614_s25 }
 0x440   : > { %s3634_s25 = smov %s2618_s26  ;;  %s3635_s26 = smov %s2744_s10 }
 0x441   : > { %s3636_s27 = smov %s2733_s30  ;;  %19 = sbr.rel (!%p17_p9) target bundleno = 3 (0x3), region = 85 }
 0x446   :  { %2396 = vsyncpa [#allocation4], 1 }
 0x447   :  { %2398 = vsyncpa [#allocation4 + $0x1], 1 }

</bundles_post_ra>
